<compile_context>
chip_gen: v7x
topology: tpu7x:2x2x1
jax: 0.10.0
libtpu: 0.0.40
codegen_flags: <defaults>
</compile_context>

<pallas_src>
import jax
import jax.numpy as jnp
from jax.experimental import pallas as pl
from jax.experimental.pallas import tpu as pltpu


# ----------------------------- Pallas kernel --------------------------------
def critic_kernel(g_ref, x_ref, len_ref,
                  w_ih_ref, b_i_ref, w_hh_ref, b_hn_ref,
                  w1g_ref, w1h_ref, b1_ref, w2_ref, b2_ref,
                  out_ref):
    # g_ref:   [Bb, K, D]     guest embeddings (one batch block)
    # x_ref:   [T*Bb, D]      asked-word embeddings, time-major rows (row = t*Bb + b)
    # len_ref: [Bb, 1] int32  dialogue lengths
    Bb, _, D = g_ref.shape
    T = x_ref.shape[0] // Bb

    g_hat = jnp.mean(g_ref[...], axis=1)               # [Bb, D]  == g_to_g_hat(g)
    lengths = len_ref[...]                              # [Bb, 1] int32

    w_ih = w_ih_ref[...]                                # [D, 3D] pre-transposed, gates (r|z|n)
    w_hh = w_hh_ref[...]                                # [D, 3D] pre-transposed, gates (r|z|n)
    b_i = b_i_ref[...]                                  # [1, 3D] = (b_ir+b_hr | b_iz+b_hz | b_in)
    b_hn = b_hn_ref[...]                                # [1, D]  (must stay inside r*(.))

    # Input-side gates for ALL timesteps in a single MXU matmul (off the serial chain).
    gi_all = jnp.dot(x_ref[...], w_ih,
                     preferred_element_type=jnp.float32) + b_i      # [T*Bb, 3D]

    h = jnp.zeros((Bb, D), jnp.float32)                 # torch GRU default initial hidden
    # T is static and small; fully unrolled recurrence -> static sublane-aligned slices,
    # one fused hidden-side MXU matmul per step on the critical path.
    for t in range(T):
        gi = gi_all[t * Bb:(t + 1) * Bb, :]             # [Bb, 3D] static slice
        gh = jnp.dot(h, w_hh, preferred_element_type=jnp.float32)   # [Bb, 3D]
        r = jax.nn.sigmoid(gi[:, 0:D] + gh[:, 0:D])
        z = jax.nn.sigmoid(gi[:, D:2 * D] + gh[:, D:2 * D])
        n = jnp.tanh(gi[:, 2 * D:3 * D] + r * (gh[:, 2 * D:3 * D] + b_hn))
        h_new = (1.0 - z) * n + z * h
        # pack_padded_sequence semantics: freeze hidden once t >= length
        h = jnp.where(t < lengths, h_new, h)

    # Head: Linear(2D -> D) over cat([g_hat, h_T]) as two pre-transposed matmuls,
    # ReLU, then Linear(D -> 1) as VPU multiply + lane reduction.
    hid = (jnp.dot(g_hat, w1g_ref[...], preferred_element_type=jnp.float32)
           + jnp.dot(h, w1h_ref[...], preferred_element_type=jnp.float32)
           + b1_ref[...])
    hid = jnp.maximum(hid, 0.0)
    out_ref[...] = jnp.sum(hid * w2_ref[...], axis=-1, keepdims=True) + b2_ref[...]


# ------------------------------ glue (JAX) -----------------------------------
def unpack_states(states, num_guests, max_len, emb_dim):
    """states: [B, K*D + T*D + 1] -> g [B,K,D], x [B,T,D], lengths [B] int32."""
    B = states.shape[0]
    kd, td = num_guests * emb_dim, max_len * emb_dim
    g = states[:, :kd].reshape(B, num_guests, emb_dim)
    x = states[:, kd:kd + td].reshape(B, max_len, emb_dim)
    # lengths travel as float32 inside the packed states tensor; exact up to 2^24.
    lengths = states[:, -1].astype(jnp.int32)
    return g, x, lengths


def init_params(key, emb_dim):
    """Deterministic, PyTorch-style uniform(-1/sqrt(D), 1/sqrt(D)) init (raw torch layout)."""
    D = emb_dim
    ks = jax.random.split(key, 10)
    s = 1.0 / jnp.sqrt(jnp.float32(D))
    u = lambda k, shape: jax.random.uniform(k, shape, jnp.float32, -s, s)
    w1 = u(ks[6], (D, 2 * D))                     # Linear(2D, D).weight
    return dict(
        w_ih=u(ks[0], (3, D, D)),                 # GRU weight_ih_l0 split (r,z,n)
        w_hh=u(ks[1], (3, D, D)),                 # GRU weight_hh_l0 split (r,z,n)
        b_ih=u(ks[2], (3, 1, D)),
        b_hh=u(ks[3], (3, 1, D)),
        w1g=w1[:, :D],                            # half acting on g_hat
        w1h=w1[:, D:],                            # half acting on h_T
        b1=u(ks[7], (1, D)),
        w2=u(ks[8], (1, D)),                      # Linear(D, 1).weight
        b2=u(ks[9], (1, 1)),
    )


def pack_params(params):
    """Wrapper-side weight packing: fuse gates along lanes, pre-transpose, pre-sum biases."""
    w_ih_f = jnp.concatenate([params["w_ih"][0].T, params["w_ih"][1].T,
                              params["w_ih"][2].T], axis=1)          # [D, 3D]
    w_hh_f = jnp.concatenate([params["w_hh"][0].T, params["w_hh"][1].T,
                              params["w_hh"][2].T], axis=1)          # [D, 3D]
    b_i_f = jnp.concatenate([params["b_ih"][0] + params["b_hh"][0],
                             params["b_ih"][1] + params["b_hh"][1],
                             params["b_ih"][2]], axis=1)             # [1, 3D]
    return dict(
        w_ih_f=w_ih_f, w_hh_f=w_hh_f, b_i_f=b_i_f,
        b_hn=params["b_hh"][2],                                      # [1, D]
        w1g_t=params["w1g"].T, w1h_t=params["w1h"].T,                # [D, D]
        b1=params["b1"], w2=params["w2"], b2=params["b2"],
    )


def critic_forward(states, params, num_guests, max_len, emb_dim, *, block_b=8):
    B = states.shape[0]
    K, T, D = num_guests, max_len, emb_dim
    block_b = min(block_b, B)
    assert B % block_b == 0, "batch must be divisible by the batch block"
    nb = B // block_b

    g, x, lengths = unpack_states(states, K, T, D)
    # Per-batch-block, time-major, flattened x: block i, row (t*block_b + j)
    # corresponds to global batch (i*block_b + j) at time t.  Pure layout plumbing.
    x_blk = (jnp.transpose(x, (1, 0, 2))              # [T, B, D]
             .reshape(T, nb, block_b, D)
             .transpose(1, 0, 2, 3)
             .reshape(nb, T * block_b, D))            # [nb, T*block_b, D]
    len2d = lengths.reshape(B, 1)

    p = pack_params(params)
    full2d = lambda a: pl.BlockSpec(a.shape, lambda i: (0, 0))   # weights: whole array

    return pl.pallas_call(
        critic_kernel,
        out_shape=jax.ShapeDtypeStruct((B, 1), jnp.float32),
        grid=(nb,),
        in_specs=[
            pl.BlockSpec((block_b, K, D), lambda i: (i, 0, 0)),            # g
            pl.BlockSpec((None, T * block_b, D), lambda i: (i, 0, 0)),     # x (lead dim squeezed)
            pl.BlockSpec((block_b, 1), lambda i: (i, 0)),                  # lengths
            full2d(p["w_ih_f"]), full2d(p["b_i_f"]),
            full2d(p["w_hh_f"]), full2d(p["b_hn"]),
            full2d(p["w1g_t"]), full2d(p["w1h_t"]),
            full2d(p["b1"]), full2d(p["w2"]), full2d(p["b2"]),
        ],
        out_specs=pl.BlockSpec((block_b, 1), lambda i: (i, 0)),
        compiler_params=pltpu.CompilerParams(
            dimension_semantics=("parallel",)),       # v7x: split batch blocks across TCs
    )(g, x_blk, len2d,
      p["w_ih_f"], p["b_i_f"], p["w_hh_f"], p["b_hn"],
      p["w1g_t"], p["w1h_t"], p["b1"], p["w2"], p["b2"])


# --------------------------- pure-JAX reference ------------------------------
def critic_reference(states, params, num_guests, max_len, emb_dim):
    g, x, lengths = unpack_states(states, num_guests, max_len, emb_dim)
    g_hat = jnp.mean(g, axis=1)
    B, T, D = x.shape
    h = jnp.zeros((B, D), jnp.float32)
    for t in range(T):
        x_t = x[:, t, :]
        gi = jnp.einsum("bd,gkd->gbk", x_t, params["w_ih"]) + params["b_ih"]
        gh = jnp.einsum("bd,gkd->gbk", h, params["w_hh"]) + params["b_hh"]
        r = jax.nn.sigmoid(gi[0] + gh[0])
        z = jax.nn.sigmoid(gi[1] + gh[1])
        n = jnp.tanh(gi[2] + r * gh[2])
        h_new = (1.0 - z) * n + z * h
        h = jnp.where((t < lengths)[:, None], h_new, h)
    hid = jax.nn.relu(g_hat @ params["w1g"].T + h @ params["w1h"].T + params["b1"])
    return hid @ params["w2"].T + params["b2"]


# --------------------------------- main ---------------------------------------
if __name__ == "__main__":
    # batch (sublane-aligned), guests, max dialogue length, emb_dim (input_size)
    B, K, T, D = 16, 4, 8, 32
    key = jax.random.PRNGKey(0)
    k_g, k_x, k_l, k_p = jax.random.split(key, 4)

    g = jax.random.normal(k_g, (B, K, D), jnp.float32)
    x = jax.random.normal(k_x, (B, T, D), jnp.float32)
    lengths = jax.random.randint(k_l, (B,), 1, T + 1).astype(jnp.float32)
    # pack into the flat `states` tensor the Critic receives: [B, K*D + T*D + 1]
    states = jnp.concatenate(
        [g.reshape(B, -1), x.reshape(B, -1), lengths.reshape(B, 1)], axis=1)

    params = init_params(k_p, D)

    out = jax.block_until_ready(critic_forward(states, params, K, T, D))

    ref = critic_reference(states, params, K, T, D)
    assert out.shape == (B, 1)
    assert jnp.allclose(out, ref, atol=1e-4, rtol=1e-4), (out, ref)

    print("KERNEL_OK")
</pallas_src>

<mosaic_0001>
module attributes {stable_mosaic.version = 11 : i64} {
  func.func @critic_kernel(%arg0: i32, %arg1: memref<8x4x32xf32, #tpu.memory_space<vmem>>, %arg2: memref<1x64x32xf32, #tpu.memory_space<vmem>>, %arg3: memref<8x1xi32, #tpu.memory_space<vmem>>, %arg4: memref<32x96xf32, #tpu.memory_space<vmem>>, %arg5: memref<1x96xf32, #tpu.memory_space<vmem>>, %arg6: memref<32x96xf32, #tpu.memory_space<vmem>>, %arg7: memref<1x32xf32, #tpu.memory_space<vmem>>, %arg8: memref<32x32xf32, #tpu.memory_space<vmem>>, %arg9: memref<32x32xf32, #tpu.memory_space<vmem>>, %arg10: memref<1x32xf32, #tpu.memory_space<vmem>>, %arg11: memref<1x32xf32, #tpu.memory_space<vmem>>, %arg12: memref<1x1xf32, #tpu.memory_space<vmem>>, %arg13: memref<8x1xf32, #tpu.memory_space<vmem>>) attributes {dimension_semantics = [#tpu.dimension_semantics<parallel>], iteration_bounds = array<i64: 2>, scalar_prefetch = 0 : i64, scratch_operands = 0 : i64, tpu.core_type = #tpu.core_type<tc>, window_params = [{transform_indices = @transform_0, window_bounds = array<i64: 8, 4, 32>}, {transform_indices = @transform_1, window_bounds = array<i64: 1, 64, 32>}, {transform_indices = @transform_2, window_bounds = array<i64: 8, 1>}, {pipeline_mode = #tpu.pipeline_mode<synchronous>, transform_indices = @transform_3, window_bounds = array<i64: 32, 96>}, {pipeline_mode = #tpu.pipeline_mode<synchronous>, transform_indices = @transform_4, window_bounds = array<i64: 1, 96>}, {pipeline_mode = #tpu.pipeline_mode<synchronous>, transform_indices = @transform_5, window_bounds = array<i64: 32, 96>}, {pipeline_mode = #tpu.pipeline_mode<synchronous>, transform_indices = @transform_6, window_bounds = array<i64: 1, 32>}, {pipeline_mode = #tpu.pipeline_mode<synchronous>, transform_indices = @transform_7, window_bounds = array<i64: 32, 32>}, {pipeline_mode = #tpu.pipeline_mode<synchronous>, transform_indices = @transform_8, window_bounds = array<i64: 32, 32>}, {pipeline_mode = #tpu.pipeline_mode<synchronous>, transform_indices = @transform_9, window_bounds = array<i64: 1, 32>}, {pipeline_mode = #tpu.pipeline_mode<synchronous>, transform_indices = @transform_10, window_bounds = array<i64: 1, 32>}, {pipeline_mode = #tpu.pipeline_mode<synchronous>, transform_indices = @transform_11, window_bounds = array<i64: 1, 1>}, {transform_indices = @transform_12, window_bounds = array<i64: 8, 1>}]} {
    %c0 = arith.constant 0 : index
    %c0_0 = arith.constant 0 : index
    %c0_1 = arith.constant 0 : index
    %0 = vector.load %arg1[%c0, %c0_0, %c0_1] : memref<8x4x32xf32, #tpu.memory_space<vmem>>, vector<8x4x32xf32>
    %cst = arith.constant dense<0.000000e+00> : vector<8x32xf32>
    %1 = vector.multi_reduction <add>, %0, %cst [1] : vector<8x4x32xf32> to vector<8x32xf32>
    %cst_2 = arith.constant 4.000000e+00 : f32
    %2 = vector.broadcast %cst_2 : f32 to vector<8x32xf32>
    %3 = arith.divf %1, %2 : vector<8x32xf32>
    %c0_3 = arith.constant 0 : index
    %c0_4 = arith.constant 0 : index
    %4 = vector.load %arg3[%c0_3, %c0_4] : memref<8x1xi32, #tpu.memory_space<vmem>>, vector<8x1xi32>
    %c0_5 = arith.constant 0 : index
    %c0_6 = arith.constant 0 : index
    %5 = vector.load %arg4[%c0_5, %c0_6] : memref<32x96xf32, #tpu.memory_space<vmem>>, vector<32x96xf32>
    %c0_7 = arith.constant 0 : index
    %c0_8 = arith.constant 0 : index
    %6 = vector.load %arg6[%c0_7, %c0_8] : memref<32x96xf32, #tpu.memory_space<vmem>>, vector<32x96xf32>
    %c0_9 = arith.constant 0 : index
    %c0_10 = arith.constant 0 : index
    %7 = vector.load %arg5[%c0_9, %c0_10] : memref<1x96xf32, #tpu.memory_space<vmem>>, vector<1x96xf32>
    %c0_11 = arith.constant 0 : index
    %c0_12 = arith.constant 0 : index
    %8 = vector.load %arg7[%c0_11, %c0_12] : memref<1x32xf32, #tpu.memory_space<vmem>>, vector<1x32xf32>
    %c0_13 = arith.constant 0 : index
    %c0_14 = arith.constant 0 : index
    %c0_15 = arith.constant 0 : index
    %9 = vector.load %arg2[%c0_13, %c0_14, %c0_15] : memref<1x64x32xf32, #tpu.memory_space<vmem>>, vector<1x64x32xf32>
    %10 = vector.shape_cast %9 : vector<1x64x32xf32> to vector<64x32xf32>
    %cst_16 = arith.constant dense<0.000000e+00> : vector<64x96xf32>
    %11 = tpu.matmul %10, %5, %cst_16 {dimension_numbers = #tpu.dot_dimension_numbers<[1], [0], [0], [1], [0, 0, 1, 1], [], []>} : vector<64x32xf32>, vector<32x96xf32>, vector<64x96xf32> -> vector<64x96xf32>
    %12 = vector.broadcast %7 : vector<1x96xf32> to vector<64x96xf32>
    %13 = arith.addf %11, %12 : vector<64x96xf32>
    %cst_17 = arith.constant 0.000000e+00 : f32
    %14 = vector.broadcast %cst_17 : f32 to vector<8x32xf32>
    %15 = vector.extract_strided_slice %13 {offsets = [0, 0], sizes = [8, 96], strides = [1, 1]} : vector<64x96xf32> to vector<8x96xf32>
    %cst_18 = arith.constant dense<0.000000e+00> : vector<8x96xf32>
    %16 = tpu.matmul %14, %6, %cst_18 {dimension_numbers = #tpu.dot_dimension_numbers<[1], [0], [0], [1], [0, 0, 1, 1], [], []>} : vector<8x32xf32>, vector<32x96xf32>, vector<8x96xf32> -> vector<8x96xf32>
    %17 = vector.extract_strided_slice %15 {offsets = [0, 0], sizes = [8, 32], strides = [1, 1]} : vector<8x96xf32> to vector<8x32xf32>
    %18 = vector.extract_strided_slice %16 {offsets = [0, 0], sizes = [8, 32], strides = [1, 1]} : vector<8x96xf32> to vector<8x32xf32>
    %19 = arith.addf %17, %18 : vector<8x32xf32>
    %20 = arith.negf %19 : vector<8x32xf32>
    %21 = math.exp %20 : vector<8x32xf32>
    %cst_19 = arith.constant 1.000000e+00 : f32
    %22 = vector.broadcast %cst_19 : f32 to vector<8x32xf32>
    %23 = arith.addf %22, %21 : vector<8x32xf32>
    %24 = arith.divf %22, %23 : vector<8x32xf32>
    %25 = vector.extract_strided_slice %15 {offsets = [0, 32], sizes = [8, 32], strides = [1, 1]} : vector<8x96xf32> to vector<8x32xf32>
    %26 = vector.extract_strided_slice %16 {offsets = [0, 32], sizes = [8, 32], strides = [1, 1]} : vector<8x96xf32> to vector<8x32xf32>
    %27 = arith.addf %25, %26 : vector<8x32xf32>
    %28 = arith.negf %27 : vector<8x32xf32>
    %29 = math.exp %28 : vector<8x32xf32>
    %cst_20 = arith.constant 1.000000e+00 : f32
    %30 = vector.broadcast %cst_20 : f32 to vector<8x32xf32>
    %31 = arith.addf %30, %29 : vector<8x32xf32>
    %32 = arith.divf %30, %31 : vector<8x32xf32>
    %33 = vector.extract_strided_slice %15 {offsets = [0, 64], sizes = [8, 32], strides = [1, 1]} : vector<8x96xf32> to vector<8x32xf32>
    %34 = vector.extract_strided_slice %16 {offsets = [0, 64], sizes = [8, 32], strides = [1, 1]} : vector<8x96xf32> to vector<8x32xf32>
    %35 = vector.broadcast %8 : vector<1x32xf32> to vector<8x32xf32>
    %36 = arith.addf %34, %35 : vector<8x32xf32>
    %37 = arith.mulf %24, %36 : vector<8x32xf32>
    %38 = arith.addf %33, %37 : vector<8x32xf32>
    %39 = math.tanh %38 : vector<8x32xf32>
    %cst_21 = arith.constant 1.000000e+00 : f32
    %40 = vector.broadcast %cst_21 : f32 to vector<8x32xf32>
    %41 = arith.subf %40, %32 : vector<8x32xf32>
    %42 = arith.mulf %41, %39 : vector<8x32xf32>
    %43 = arith.mulf %32, %14 : vector<8x32xf32>
    %44 = arith.addf %42, %43 : vector<8x32xf32>
    %c0_i32 = arith.constant 0 : i32
    %45 = vector.broadcast %c0_i32 : i32 to vector<8x1xi32>
    %46 = arith.cmpi sgt, %4, %45 : vector<8x1xi32>
    %47 = vector.shape_cast %46 : vector<8x1xi1> to vector<8x1xi1>
    %48 = vector.broadcast %47 : vector<8x1xi1> to vector<8x32xi1>
    %49 = arith.select %48, %44, %14 : vector<8x32xi1>, vector<8x32xf32>
    %50 = vector.extract_strided_slice %13 {offsets = [8, 0], sizes = [8, 96], strides = [1, 1]} : vector<64x96xf32> to vector<8x96xf32>
    %cst_22 = arith.constant dense<0.000000e+00> : vector<8x96xf32>
    %51 = tpu.matmul %49, %6, %cst_22 {dimension_numbers = #tpu.dot_dimension_numbers<[1], [0], [0], [1], [0, 0, 1, 1], [], []>} : vector<8x32xf32>, vector<32x96xf32>, vector<8x96xf32> -> vector<8x96xf32>
    %52 = vector.extract_strided_slice %50 {offsets = [0, 0], sizes = [8, 32], strides = [1, 1]} : vector<8x96xf32> to vector<8x32xf32>
    %53 = vector.extract_strided_slice %51 {offsets = [0, 0], sizes = [8, 32], strides = [1, 1]} : vector<8x96xf32> to vector<8x32xf32>
    %54 = arith.addf %52, %53 : vector<8x32xf32>
    %55 = arith.negf %54 : vector<8x32xf32>
    %56 = math.exp %55 : vector<8x32xf32>
    %cst_23 = arith.constant 1.000000e+00 : f32
    %57 = vector.broadcast %cst_23 : f32 to vector<8x32xf32>
    %58 = arith.addf %57, %56 : vector<8x32xf32>
    %59 = arith.divf %57, %58 : vector<8x32xf32>
    %60 = vector.extract_strided_slice %50 {offsets = [0, 32], sizes = [8, 32], strides = [1, 1]} : vector<8x96xf32> to vector<8x32xf32>
    %61 = vector.extract_strided_slice %51 {offsets = [0, 32], sizes = [8, 32], strides = [1, 1]} : vector<8x96xf32> to vector<8x32xf32>
    %62 = arith.addf %60, %61 : vector<8x32xf32>
    %63 = arith.negf %62 : vector<8x32xf32>
    %64 = math.exp %63 : vector<8x32xf32>
    %cst_24 = arith.constant 1.000000e+00 : f32
    %65 = vector.broadcast %cst_24 : f32 to vector<8x32xf32>
    %66 = arith.addf %65, %64 : vector<8x32xf32>
    %67 = arith.divf %65, %66 : vector<8x32xf32>
    %68 = vector.extract_strided_slice %50 {offsets = [0, 64], sizes = [8, 32], strides = [1, 1]} : vector<8x96xf32> to vector<8x32xf32>
    %69 = vector.extract_strided_slice %51 {offsets = [0, 64], sizes = [8, 32], strides = [1, 1]} : vector<8x96xf32> to vector<8x32xf32>
    %70 = vector.broadcast %8 : vector<1x32xf32> to vector<8x32xf32>
    %71 = arith.addf %69, %70 : vector<8x32xf32>
    %72 = arith.mulf %59, %71 : vector<8x32xf32>
    %73 = arith.addf %68, %72 : vector<8x32xf32>
    %74 = math.tanh %73 : vector<8x32xf32>
    %cst_25 = arith.constant 1.000000e+00 : f32
    %75 = vector.broadcast %cst_25 : f32 to vector<8x32xf32>
    %76 = arith.subf %75, %67 : vector<8x32xf32>
    %77 = arith.mulf %76, %74 : vector<8x32xf32>
    %78 = arith.mulf %67, %49 : vector<8x32xf32>
    %79 = arith.addf %77, %78 : vector<8x32xf32>
    %c1_i32 = arith.constant 1 : i32
    %80 = vector.broadcast %c1_i32 : i32 to vector<8x1xi32>
    %81 = arith.cmpi sgt, %4, %80 : vector<8x1xi32>
    %82 = vector.shape_cast %81 : vector<8x1xi1> to vector<8x1xi1>
    %83 = vector.broadcast %82 : vector<8x1xi1> to vector<8x32xi1>
    %84 = arith.select %83, %79, %49 : vector<8x32xi1>, vector<8x32xf32>
    %85 = vector.extract_strided_slice %13 {offsets = [16, 0], sizes = [8, 96], strides = [1, 1]} : vector<64x96xf32> to vector<8x96xf32>
    %cst_26 = arith.constant dense<0.000000e+00> : vector<8x96xf32>
    %86 = tpu.matmul %84, %6, %cst_26 {dimension_numbers = #tpu.dot_dimension_numbers<[1], [0], [0], [1], [0, 0, 1, 1], [], []>} : vector<8x32xf32>, vector<32x96xf32>, vector<8x96xf32> -> vector<8x96xf32>
    %87 = vector.extract_strided_slice %85 {offsets = [0, 0], sizes = [8, 32], strides = [1, 1]} : vector<8x96xf32> to vector<8x32xf32>
    %88 = vector.extract_strided_slice %86 {offsets = [0, 0], sizes = [8, 32], strides = [1, 1]} : vector<8x96xf32> to vector<8x32xf32>
    %89 = arith.addf %87, %88 : vector<8x32xf32>
    %90 = arith.negf %89 : vector<8x32xf32>
    %91 = math.exp %90 : vector<8x32xf32>
    %cst_27 = arith.constant 1.000000e+00 : f32
    %92 = vector.broadcast %cst_27 : f32 to vector<8x32xf32>
    %93 = arith.addf %92, %91 : vector<8x32xf32>
    %94 = arith.divf %92, %93 : vector<8x32xf32>
    %95 = vector.extract_strided_slice %85 {offsets = [0, 32], sizes = [8, 32], strides = [1, 1]} : vector<8x96xf32> to vector<8x32xf32>
    %96 = vector.extract_strided_slice %86 {offsets = [0, 32], sizes = [8, 32], strides = [1, 1]} : vector<8x96xf32> to vector<8x32xf32>
    %97 = arith.addf %95, %96 : vector<8x32xf32>
    %98 = arith.negf %97 : vector<8x32xf32>
    %99 = math.exp %98 : vector<8x32xf32>
    %cst_28 = arith.constant 1.000000e+00 : f32
    %100 = vector.broadcast %cst_28 : f32 to vector<8x32xf32>
    %101 = arith.addf %100, %99 : vector<8x32xf32>
    %102 = arith.divf %100, %101 : vector<8x32xf32>
    %103 = vector.extract_strided_slice %85 {offsets = [0, 64], sizes = [8, 32], strides = [1, 1]} : vector<8x96xf32> to vector<8x32xf32>
    %104 = vector.extract_strided_slice %86 {offsets = [0, 64], sizes = [8, 32], strides = [1, 1]} : vector<8x96xf32> to vector<8x32xf32>
    %105 = vector.broadcast %8 : vector<1x32xf32> to vector<8x32xf32>
    %106 = arith.addf %104, %105 : vector<8x32xf32>
    %107 = arith.mulf %94, %106 : vector<8x32xf32>
    %108 = arith.addf %103, %107 : vector<8x32xf32>
    %109 = math.tanh %108 : vector<8x32xf32>
    %cst_29 = arith.constant 1.000000e+00 : f32
    %110 = vector.broadcast %cst_29 : f32 to vector<8x32xf32>
    %111 = arith.subf %110, %102 : vector<8x32xf32>
    %112 = arith.mulf %111, %109 : vector<8x32xf32>
    %113 = arith.mulf %102, %84 : vector<8x32xf32>
    %114 = arith.addf %112, %113 : vector<8x32xf32>
    %c2_i32 = arith.constant 2 : i32
    %115 = vector.broadcast %c2_i32 : i32 to vector<8x1xi32>
    %116 = arith.cmpi sgt, %4, %115 : vector<8x1xi32>
    %117 = vector.shape_cast %116 : vector<8x1xi1> to vector<8x1xi1>
    %118 = vector.broadcast %117 : vector<8x1xi1> to vector<8x32xi1>
    %119 = arith.select %118, %114, %84 : vector<8x32xi1>, vector<8x32xf32>
    %120 = vector.extract_strided_slice %13 {offsets = [24, 0], sizes = [8, 96], strides = [1, 1]} : vector<64x96xf32> to vector<8x96xf32>
    %cst_30 = arith.constant dense<0.000000e+00> : vector<8x96xf32>
    %121 = tpu.matmul %119, %6, %cst_30 {dimension_numbers = #tpu.dot_dimension_numbers<[1], [0], [0], [1], [0, 0, 1, 1], [], []>} : vector<8x32xf32>, vector<32x96xf32>, vector<8x96xf32> -> vector<8x96xf32>
    %122 = vector.extract_strided_slice %120 {offsets = [0, 0], sizes = [8, 32], strides = [1, 1]} : vector<8x96xf32> to vector<8x32xf32>
    %123 = vector.extract_strided_slice %121 {offsets = [0, 0], sizes = [8, 32], strides = [1, 1]} : vector<8x96xf32> to vector<8x32xf32>
    %124 = arith.addf %122, %123 : vector<8x32xf32>
    %125 = arith.negf %124 : vector<8x32xf32>
    %126 = math.exp %125 : vector<8x32xf32>
    %cst_31 = arith.constant 1.000000e+00 : f32
    %127 = vector.broadcast %cst_31 : f32 to vector<8x32xf32>
    %128 = arith.addf %127, %126 : vector<8x32xf32>
    %129 = arith.divf %127, %128 : vector<8x32xf32>
    %130 = vector.extract_strided_slice %120 {offsets = [0, 32], sizes = [8, 32], strides = [1, 1]} : vector<8x96xf32> to vector<8x32xf32>
    %131 = vector.extract_strided_slice %121 {offsets = [0, 32], sizes = [8, 32], strides = [1, 1]} : vector<8x96xf32> to vector<8x32xf32>
    %132 = arith.addf %130, %131 : vector<8x32xf32>
    %133 = arith.negf %132 : vector<8x32xf32>
    %134 = math.exp %133 : vector<8x32xf32>
    %cst_32 = arith.constant 1.000000e+00 : f32
    %135 = vector.broadcast %cst_32 : f32 to vector<8x32xf32>
    %136 = arith.addf %135, %134 : vector<8x32xf32>
    %137 = arith.divf %135, %136 : vector<8x32xf32>
    %138 = vector.extract_strided_slice %120 {offsets = [0, 64], sizes = [8, 32], strides = [1, 1]} : vector<8x96xf32> to vector<8x32xf32>
    %139 = vector.extract_strided_slice %121 {offsets = [0, 64], sizes = [8, 32], strides = [1, 1]} : vector<8x96xf32> to vector<8x32xf32>
    %140 = vector.broadcast %8 : vector<1x32xf32> to vector<8x32xf32>
    %141 = arith.addf %139, %140 : vector<8x32xf32>
    %142 = arith.mulf %129, %141 : vector<8x32xf32>
    %143 = arith.addf %138, %142 : vector<8x32xf32>
    %144 = math.tanh %143 : vector<8x32xf32>
    %cst_33 = arith.constant 1.000000e+00 : f32
    %145 = vector.broadcast %cst_33 : f32 to vector<8x32xf32>
    %146 = arith.subf %145, %137 : vector<8x32xf32>
    %147 = arith.mulf %146, %144 : vector<8x32xf32>
    %148 = arith.mulf %137, %119 : vector<8x32xf32>
    %149 = arith.addf %147, %148 : vector<8x32xf32>
    %c3_i32 = arith.constant 3 : i32
    %150 = vector.broadcast %c3_i32 : i32 to vector<8x1xi32>
    %151 = arith.cmpi sgt, %4, %150 : vector<8x1xi32>
    %152 = vector.shape_cast %151 : vector<8x1xi1> to vector<8x1xi1>
    %153 = vector.broadcast %152 : vector<8x1xi1> to vector<8x32xi1>
    %154 = arith.select %153, %149, %119 : vector<8x32xi1>, vector<8x32xf32>
    %155 = vector.extract_strided_slice %13 {offsets = [32, 0], sizes = [8, 96], strides = [1, 1]} : vector<64x96xf32> to vector<8x96xf32>
    %cst_34 = arith.constant dense<0.000000e+00> : vector<8x96xf32>
    %156 = tpu.matmul %154, %6, %cst_34 {dimension_numbers = #tpu.dot_dimension_numbers<[1], [0], [0], [1], [0, 0, 1, 1], [], []>} : vector<8x32xf32>, vector<32x96xf32>, vector<8x96xf32> -> vector<8x96xf32>
    %157 = vector.extract_strided_slice %155 {offsets = [0, 0], sizes = [8, 32], strides = [1, 1]} : vector<8x96xf32> to vector<8x32xf32>
    %158 = vector.extract_strided_slice %156 {offsets = [0, 0], sizes = [8, 32], strides = [1, 1]} : vector<8x96xf32> to vector<8x32xf32>
    %159 = arith.addf %157, %158 : vector<8x32xf32>
    %160 = arith.negf %159 : vector<8x32xf32>
    %161 = math.exp %160 : vector<8x32xf32>
    %cst_35 = arith.constant 1.000000e+00 : f32
    %162 = vector.broadcast %cst_35 : f32 to vector<8x32xf32>
    %163 = arith.addf %162, %161 : vector<8x32xf32>
    %164 = arith.divf %162, %163 : vector<8x32xf32>
    %165 = vector.extract_strided_slice %155 {offsets = [0, 32], sizes = [8, 32], strides = [1, 1]} : vector<8x96xf32> to vector<8x32xf32>
    %166 = vector.extract_strided_slice %156 {offsets = [0, 32], sizes = [8, 32], strides = [1, 1]} : vector<8x96xf32> to vector<8x32xf32>
    %167 = arith.addf %165, %166 : vector<8x32xf32>
    %168 = arith.negf %167 : vector<8x32xf32>
    %169 = math.exp %168 : vector<8x32xf32>
    %cst_36 = arith.constant 1.000000e+00 : f32
    %170 = vector.broadcast %cst_36 : f32 to vector<8x32xf32>
    %171 = arith.addf %170, %169 : vector<8x32xf32>
    %172 = arith.divf %170, %171 : vector<8x32xf32>
    %173 = vector.extract_strided_slice %155 {offsets = [0, 64], sizes = [8, 32], strides = [1, 1]} : vector<8x96xf32> to vector<8x32xf32>
    %174 = vector.extract_strided_slice %156 {offsets = [0, 64], sizes = [8, 32], strides = [1, 1]} : vector<8x96xf32> to vector<8x32xf32>
    %175 = vector.broadcast %8 : vector<1x32xf32> to vector<8x32xf32>
    %176 = arith.addf %174, %175 : vector<8x32xf32>
    %177 = arith.mulf %164, %176 : vector<8x32xf32>
    %178 = arith.addf %173, %177 : vector<8x32xf32>
    %179 = math.tanh %178 : vector<8x32xf32>
    %cst_37 = arith.constant 1.000000e+00 : f32
    %180 = vector.broadcast %cst_37 : f32 to vector<8x32xf32>
    %181 = arith.subf %180, %172 : vector<8x32xf32>
    %182 = arith.mulf %181, %179 : vector<8x32xf32>
    %183 = arith.mulf %172, %154 : vector<8x32xf32>
    %184 = arith.addf %182, %183 : vector<8x32xf32>
    %c4_i32 = arith.constant 4 : i32
    %185 = vector.broadcast %c4_i32 : i32 to vector<8x1xi32>
    %186 = arith.cmpi sgt, %4, %185 : vector<8x1xi32>
    %187 = vector.shape_cast %186 : vector<8x1xi1> to vector<8x1xi1>
    %188 = vector.broadcast %187 : vector<8x1xi1> to vector<8x32xi1>
    %189 = arith.select %188, %184, %154 : vector<8x32xi1>, vector<8x32xf32>
    %190 = vector.extract_strided_slice %13 {offsets = [40, 0], sizes = [8, 96], strides = [1, 1]} : vector<64x96xf32> to vector<8x96xf32>
    %cst_38 = arith.constant dense<0.000000e+00> : vector<8x96xf32>
    %191 = tpu.matmul %189, %6, %cst_38 {dimension_numbers = #tpu.dot_dimension_numbers<[1], [0], [0], [1], [0, 0, 1, 1], [], []>} : vector<8x32xf32>, vector<32x96xf32>, vector<8x96xf32> -> vector<8x96xf32>
    %192 = vector.extract_strided_slice %190 {offsets = [0, 0], sizes = [8, 32], strides = [1, 1]} : vector<8x96xf32> to vector<8x32xf32>
    %193 = vector.extract_strided_slice %191 {offsets = [0, 0], sizes = [8, 32], strides = [1, 1]} : vector<8x96xf32> to vector<8x32xf32>
    %194 = arith.addf %192, %193 : vector<8x32xf32>
    %195 = arith.negf %194 : vector<8x32xf32>
    %196 = math.exp %195 : vector<8x32xf32>
    %cst_39 = arith.constant 1.000000e+00 : f32
    %197 = vector.broadcast %cst_39 : f32 to vector<8x32xf32>
    %198 = arith.addf %197, %196 : vector<8x32xf32>
    %199 = arith.divf %197, %198 : vector<8x32xf32>
    %200 = vector.extract_strided_slice %190 {offsets = [0, 32], sizes = [8, 32], strides = [1, 1]} : vector<8x96xf32> to vector<8x32xf32>
    %201 = vector.extract_strided_slice %191 {offsets = [0, 32], sizes = [8, 32], strides = [1, 1]} : vector<8x96xf32> to vector<8x32xf32>
    %202 = arith.addf %200, %201 : vector<8x32xf32>
    %203 = arith.negf %202 : vector<8x32xf32>
    %204 = math.exp %203 : vector<8x32xf32>
    %cst_40 = arith.constant 1.000000e+00 : f32
    %205 = vector.broadcast %cst_40 : f32 to vector<8x32xf32>
    %206 = arith.addf %205, %204 : vector<8x32xf32>
    %207 = arith.divf %205, %206 : vector<8x32xf32>
    %208 = vector.extract_strided_slice %190 {offsets = [0, 64], sizes = [8, 32], strides = [1, 1]} : vector<8x96xf32> to vector<8x32xf32>
    %209 = vector.extract_strided_slice %191 {offsets = [0, 64], sizes = [8, 32], strides = [1, 1]} : vector<8x96xf32> to vector<8x32xf32>
    %210 = vector.broadcast %8 : vector<1x32xf32> to vector<8x32xf32>
    %211 = arith.addf %209, %210 : vector<8x32xf32>
    %212 = arith.mulf %199, %211 : vector<8x32xf32>
    %213 = arith.addf %208, %212 : vector<8x32xf32>
    %214 = math.tanh %213 : vector<8x32xf32>
    %cst_41 = arith.constant 1.000000e+00 : f32
    %215 = vector.broadcast %cst_41 : f32 to vector<8x32xf32>
    %216 = arith.subf %215, %207 : vector<8x32xf32>
    %217 = arith.mulf %216, %214 : vector<8x32xf32>
    %218 = arith.mulf %207, %189 : vector<8x32xf32>
    %219 = arith.addf %217, %218 : vector<8x32xf32>
    %c5_i32 = arith.constant 5 : i32
    %220 = vector.broadcast %c5_i32 : i32 to vector<8x1xi32>
    %221 = arith.cmpi sgt, %4, %220 : vector<8x1xi32>
    %222 = vector.shape_cast %221 : vector<8x1xi1> to vector<8x1xi1>
    %223 = vector.broadcast %222 : vector<8x1xi1> to vector<8x32xi1>
    %224 = arith.select %223, %219, %189 : vector<8x32xi1>, vector<8x32xf32>
    %225 = vector.extract_strided_slice %13 {offsets = [48, 0], sizes = [8, 96], strides = [1, 1]} : vector<64x96xf32> to vector<8x96xf32>
    %cst_42 = arith.constant dense<0.000000e+00> : vector<8x96xf32>
    %226 = tpu.matmul %224, %6, %cst_42 {dimension_numbers = #tpu.dot_dimension_numbers<[1], [0], [0], [1], [0, 0, 1, 1], [], []>} : vector<8x32xf32>, vector<32x96xf32>, vector<8x96xf32> -> vector<8x96xf32>
    %227 = vector.extract_strided_slice %225 {offsets = [0, 0], sizes = [8, 32], strides = [1, 1]} : vector<8x96xf32> to vector<8x32xf32>
    %228 = vector.extract_strided_slice %226 {offsets = [0, 0], sizes = [8, 32], strides = [1, 1]} : vector<8x96xf32> to vector<8x32xf32>
    %229 = arith.addf %227, %228 : vector<8x32xf32>
    %230 = arith.negf %229 : vector<8x32xf32>
    %231 = math.exp %230 : vector<8x32xf32>
    %cst_43 = arith.constant 1.000000e+00 : f32
    %232 = vector.broadcast %cst_43 : f32 to vector<8x32xf32>
    %233 = arith.addf %232, %231 : vector<8x32xf32>
    %234 = arith.divf %232, %233 : vector<8x32xf32>
    %235 = vector.extract_strided_slice %225 {offsets = [0, 32], sizes = [8, 32], strides = [1, 1]} : vector<8x96xf32> to vector<8x32xf32>
    %236 = vector.extract_strided_slice %226 {offsets = [0, 32], sizes = [8, 32], strides = [1, 1]} : vector<8x96xf32> to vector<8x32xf32>
    %237 = arith.addf %235, %236 : vector<8x32xf32>
    %238 = arith.negf %237 : vector<8x32xf32>
    %239 = math.exp %238 : vector<8x32xf32>
    %cst_44 = arith.constant 1.000000e+00 : f32
    %240 = vector.broadcast %cst_44 : f32 to vector<8x32xf32>
    %241 = arith.addf %240, %239 : vector<8x32xf32>
    %242 = arith.divf %240, %241 : vector<8x32xf32>
    %243 = vector.extract_strided_slice %225 {offsets = [0, 64], sizes = [8, 32], strides = [1, 1]} : vector<8x96xf32> to vector<8x32xf32>
    %244 = vector.extract_strided_slice %226 {offsets = [0, 64], sizes = [8, 32], strides = [1, 1]} : vector<8x96xf32> to vector<8x32xf32>
    %245 = vector.broadcast %8 : vector<1x32xf32> to vector<8x32xf32>
    %246 = arith.addf %244, %245 : vector<8x32xf32>
    %247 = arith.mulf %234, %246 : vector<8x32xf32>
    %248 = arith.addf %243, %247 : vector<8x32xf32>
    %249 = math.tanh %248 : vector<8x32xf32>
    %cst_45 = arith.constant 1.000000e+00 : f32
    %250 = vector.broadcast %cst_45 : f32 to vector<8x32xf32>
    %251 = arith.subf %250, %242 : vector<8x32xf32>
    %252 = arith.mulf %251, %249 : vector<8x32xf32>
    %253 = arith.mulf %242, %224 : vector<8x32xf32>
    %254 = arith.addf %252, %253 : vector<8x32xf32>
    %c6_i32 = arith.constant 6 : i32
    %255 = vector.broadcast %c6_i32 : i32 to vector<8x1xi32>
    %256 = arith.cmpi sgt, %4, %255 : vector<8x1xi32>
    %257 = vector.shape_cast %256 : vector<8x1xi1> to vector<8x1xi1>
    %258 = vector.broadcast %257 : vector<8x1xi1> to vector<8x32xi1>
    %259 = arith.select %258, %254, %224 : vector<8x32xi1>, vector<8x32xf32>
    %260 = vector.extract_strided_slice %13 {offsets = [56, 0], sizes = [8, 96], strides = [1, 1]} : vector<64x96xf32> to vector<8x96xf32>
    %cst_46 = arith.constant dense<0.000000e+00> : vector<8x96xf32>
    %261 = tpu.matmul %259, %6, %cst_46 {dimension_numbers = #tpu.dot_dimension_numbers<[1], [0], [0], [1], [0, 0, 1, 1], [], []>} : vector<8x32xf32>, vector<32x96xf32>, vector<8x96xf32> -> vector<8x96xf32>
    %262 = vector.extract_strided_slice %260 {offsets = [0, 0], sizes = [8, 32], strides = [1, 1]} : vector<8x96xf32> to vector<8x32xf32>
    %263 = vector.extract_strided_slice %261 {offsets = [0, 0], sizes = [8, 32], strides = [1, 1]} : vector<8x96xf32> to vector<8x32xf32>
    %264 = arith.addf %262, %263 : vector<8x32xf32>
    %265 = arith.negf %264 : vector<8x32xf32>
    %266 = math.exp %265 : vector<8x32xf32>
    %cst_47 = arith.constant 1.000000e+00 : f32
    %267 = vector.broadcast %cst_47 : f32 to vector<8x32xf32>
    %268 = arith.addf %267, %266 : vector<8x32xf32>
    %269 = arith.divf %267, %268 : vector<8x32xf32>
    %270 = vector.extract_strided_slice %260 {offsets = [0, 32], sizes = [8, 32], strides = [1, 1]} : vector<8x96xf32> to vector<8x32xf32>
    %271 = vector.extract_strided_slice %261 {offsets = [0, 32], sizes = [8, 32], strides = [1, 1]} : vector<8x96xf32> to vector<8x32xf32>
    %272 = arith.addf %270, %271 : vector<8x32xf32>
    %273 = arith.negf %272 : vector<8x32xf32>
    %274 = math.exp %273 : vector<8x32xf32>
    %cst_48 = arith.constant 1.000000e+00 : f32
    %275 = vector.broadcast %cst_48 : f32 to vector<8x32xf32>
    %276 = arith.addf %275, %274 : vector<8x32xf32>
    %277 = arith.divf %275, %276 : vector<8x32xf32>
    %278 = vector.extract_strided_slice %260 {offsets = [0, 64], sizes = [8, 32], strides = [1, 1]} : vector<8x96xf32> to vector<8x32xf32>
    %279 = vector.extract_strided_slice %261 {offsets = [0, 64], sizes = [8, 32], strides = [1, 1]} : vector<8x96xf32> to vector<8x32xf32>
    %280 = vector.broadcast %8 : vector<1x32xf32> to vector<8x32xf32>
    %281 = arith.addf %279, %280 : vector<8x32xf32>
    %282 = arith.mulf %269, %281 : vector<8x32xf32>
    %283 = arith.addf %278, %282 : vector<8x32xf32>
    %284 = math.tanh %283 : vector<8x32xf32>
    %cst_49 = arith.constant 1.000000e+00 : f32
    %285 = vector.broadcast %cst_49 : f32 to vector<8x32xf32>
    %286 = arith.subf %285, %277 : vector<8x32xf32>
    %287 = arith.mulf %286, %284 : vector<8x32xf32>
    %288 = arith.mulf %277, %259 : vector<8x32xf32>
    %289 = arith.addf %287, %288 : vector<8x32xf32>
    %c7_i32 = arith.constant 7 : i32
    %290 = vector.broadcast %c7_i32 : i32 to vector<8x1xi32>
    %291 = arith.cmpi sgt, %4, %290 : vector<8x1xi32>
    %292 = vector.shape_cast %291 : vector<8x1xi1> to vector<8x1xi1>
    %293 = vector.broadcast %292 : vector<8x1xi1> to vector<8x32xi1>
    %294 = arith.select %293, %289, %259 : vector<8x32xi1>, vector<8x32xf32>
    %c0_50 = arith.constant 0 : index
    %c0_51 = arith.constant 0 : index
    %295 = vector.load %arg8[%c0_50, %c0_51] : memref<32x32xf32, #tpu.memory_space<vmem>>, vector<32x32xf32>
    %cst_52 = arith.constant dense<0.000000e+00> : vector<8x32xf32>
    %296 = tpu.matmul %3, %295, %cst_52 {dimension_numbers = #tpu.dot_dimension_numbers<[1], [0], [0], [1], [0, 0, 1, 1], [], []>} : vector<8x32xf32>, vector<32x32xf32>, vector<8x32xf32> -> vector<8x32xf32>
    %c0_53 = arith.constant 0 : index
    %c0_54 = arith.constant 0 : index
    %297 = vector.load %arg9[%c0_53, %c0_54] : memref<32x32xf32, #tpu.memory_space<vmem>>, vector<32x32xf32>
    %cst_55 = arith.constant dense<0.000000e+00> : vector<8x32xf32>
    %298 = tpu.matmul %294, %297, %cst_55 {dimension_numbers = #tpu.dot_dimension_numbers<[1], [0], [0], [1], [0, 0, 1, 1], [], []>} : vector<8x32xf32>, vector<32x32xf32>, vector<8x32xf32> -> vector<8x32xf32>
    %299 = arith.addf %296, %298 : vector<8x32xf32>
    %c0_56 = arith.constant 0 : index
    %c0_57 = arith.constant 0 : index
    %300 = vector.load %arg10[%c0_56, %c0_57] : memref<1x32xf32, #tpu.memory_space<vmem>>, vector<1x32xf32>
    %301 = vector.broadcast %300 : vector<1x32xf32> to vector<8x32xf32>
    %302 = arith.addf %299, %301 : vector<8x32xf32>
    %cst_58 = arith.constant 0.000000e+00 : f32
    %303 = vector.broadcast %cst_58 : f32 to vector<8x32xf32>
    %304 = arith.maximumf %302, %303 : vector<8x32xf32>
    %c0_59 = arith.constant 0 : index
    %c0_60 = arith.constant 0 : index
    %305 = vector.load %arg11[%c0_59, %c0_60] : memref<1x32xf32, #tpu.memory_space<vmem>>, vector<1x32xf32>
    %306 = vector.broadcast %305 : vector<1x32xf32> to vector<8x32xf32>
    %307 = arith.mulf %304, %306 : vector<8x32xf32>
    %cst_61 = arith.constant dense<0.000000e+00> : vector<8xf32>
    %308 = vector.multi_reduction <add>, %307, %cst_61 [1] : vector<8x32xf32> to vector<8xf32>
    %309 = vector.shape_cast %308 : vector<8xf32> to vector<8x1xf32>
    %c0_62 = arith.constant 0 : index
    %c0_63 = arith.constant 0 : index
    %310 = vector.load %arg12[%c0_62, %c0_63] : memref<1x1xf32, #tpu.memory_space<vmem>>, vector<1x1xf32>
    %311 = vector.broadcast %310 : vector<1x1xf32> to vector<8x1xf32>
    %312 = arith.addf %309, %311 : vector<8x1xf32>
    %c0_64 = arith.constant 0 : index
    %c0_65 = arith.constant 0 : index
    %313 = vector.load %arg13[%c0_64, %c0_65] : memref<8x1xf32, #tpu.memory_space<vmem>>, vector<8x1xf32>
    tpu.vector_store %arg13[%c0_64, %c0_65], %312 {strides = array<i32>} : memref<8x1xf32, #tpu.memory_space<vmem>>, vector<8x1xf32>,
    return
  }
  func.func @transform_0(%arg0: i32) -> (i32, i32, i32) {
    %c0_i32 = arith.constant 0 : i32
    %c0_i32_0 = arith.constant 0 : i32
    %c0_i32_1 = arith.constant 0 : i32
    return %arg0, %c0_i32, %c0_i32_0 : i32, i32, i32
  }
  func.func @transform_1(%arg0: i32) -> (i32, i32, i32) {
    %c0_i32 = arith.constant 0 : i32
    %c0_i32_0 = arith.constant 0 : i32
    %c0_i32_1 = arith.constant 0 : i32
    return %arg0, %c0_i32, %c0_i32_0 : i32, i32, i32
  }
  func.func @transform_2(%arg0: i32) -> (i32, i32) {
    %c0_i32 = arith.constant 0 : i32
    %c0_i32_0 = arith.constant 0 : i32
    return %arg0, %c0_i32 : i32, i32
  }
  func.func @transform_3(%arg0: i32) -> (i32, i32) {
    %c0_i32 = arith.constant 0 : i32
    %c0_i32_0 = arith.constant 0 : i32
    %c0_i32_1 = arith.constant 0 : i32
    return %c0_i32, %c0_i32_0 : i32, i32
  }
  func.func @transform_4(%arg0: i32) -> (i32, i32) {
    %c0_i32 = arith.constant 0 : i32
    %c0_i32_0 = arith.constant 0 : i32
    %c0_i32_1 = arith.constant 0 : i32
    return %c0_i32, %c0_i32_0 : i32, i32
  }
  func.func @transform_5(%arg0: i32) -> (i32, i32) {
    %c0_i32 = arith.constant 0 : i32
    %c0_i32_0 = arith.constant 0 : i32
    %c0_i32_1 = arith.constant 0 : i32
    return %c0_i32, %c0_i32_0 : i32, i32
  }
  func.func @transform_6(%arg0: i32) -> (i32, i32) {
    %c0_i32 = arith.constant 0 : i32
    %c0_i32_0 = arith.constant 0 : i32
    %c0_i32_1 = arith.constant 0 : i32
    return %c0_i32, %c0_i32_0 : i32, i32
  }
  func.func @transform_7(%arg0: i32) -> (i32, i32) {
    %c0_i32 = arith.constant 0 : i32
    %c0_i32_0 = arith.constant 0 : i32
    %c0_i32_1 = arith.constant 0 : i32
    return %c0_i32, %c0_i32_0 : i32, i32
  }
  func.func @transform_8(%arg0: i32) -> (i32, i32) {
    %c0_i32 = arith.constant 0 : i32
    %c0_i32_0 = arith.constant 0 : i32
    %c0_i32_1 = arith.constant 0 : i32
    return %c0_i32, %c0_i32_0 : i32, i32
  }
  func.func @transform_9(%arg0: i32) -> (i32, i32) {
    %c0_i32 = arith.constant 0 : i32
    %c0_i32_0 = arith.constant 0 : i32
    %c0_i32_1 = arith.constant 0 : i32
    return %c0_i32, %c0_i32_0 : i32, i32
  }
  func.func @transform_10(%arg0: i32) -> (i32, i32) {
    %c0_i32 = arith.constant 0 : i32
    %c0_i32_0 = arith.constant 0 : i32
    %c0_i32_1 = arith.constant 0 : i32
    return %c0_i32, %c0_i32_0 : i32, i32
  }
  func.func @transform_11(%arg0: i32) -> (i32, i32) {
    %c0_i32 = arith.constant 0 : i32
    %c0_i32_0 = arith.constant 0 : i32
    %c0_i32_1 = arith.constant 0 : i32
    return %c0_i32, %c0_i32_0 : i32, i32
  }
  func.func @transform_12(%arg0: i32) -> (i32, i32) {
    %c0_i32 = arith.constant 0 : i32
    %c0_i32_0 = arith.constant 0 : i32
    return %arg0, %c0_i32 : i32, i32
  }
}

</mosaic_0001>

<bundles_post_ra>
// kernel: tpu_custom_call.1
= control target key start
LH: loop header
LB: loop body
LE: loop exit
PB: predicated region body
PF: predicated region fallthrough
CT: control target
= control target key end

     0   :  { %s2294_s23 = smov 0   ;;  %s2582_s0 = inlined_call_operand.vmem [shape: f32[16,4,32], index: 0, kind: input, shape index: {}]   ;;  %s2583_s1 = inlined_call_operand.vmem [shape: f32[2,64,32], index: 1, kind: input, shape index: {}]   ;;  %s2584_s2 = inlined_call_operand.vmem [shape: s32[16,1], index: 2, kind: input, shape index: {}]   ;;  %s2585_s3 = inlined_call_operand.vmem [shape: f32[32,96], index: 3, kind: input, shape index: {}]   ;;  %s2586_s4 = inlined_call_operand.vmem [shape: f32[1,96], index: 4, kind: input, shape index: {}]   ;;  %s2587_s5 = inlined_call_operand.vmem [shape: f32[32,96], index: 5, kind: input, shape index: {}]   ;;  %s2588_s6 = inlined_call_operand.vmem [shape: f32[1,32], index: 6, kind: input, shape index: {}]   ;;  %s2589_s7 = inlined_call_operand.vmem [shape: f32[32,32], index: 7, kind: input, shape index: {}]   ;;  %s2590_s8 = inlined_call_operand.vmem [shape: f32[32,32], index: 8, kind: input, shape index: {}]   ;;  %s2591_s9 = inlined_call_operand.vmem [shape: f32[1,32], index: 9, kind: input, shape index: {}]   ;;  %s2592_s10 = inlined_call_operand.vmem [shape: f32[1,32], index: 10, kind: input, shape index: {}]   ;;  %s2593_s11 = inlined_call_operand.<no memory space> [shape: f32[1,1], index: 11, kind: input, shape index: {}]   ;;  %s2594_s12 = inlined_call_operand.vmem [shape: f32[16,1], index: 12, kind: output, shape index: {}]  }
   0x1   :  { %v17_v0 = vstv %s2593_s11 }
   0x2   :  { %18 = vst [vmem:[#allocation2] sm:$0x1] %v17_v0 }
   0x3 LB: > { %s2300_s24 = sadd.s32 4294967295, %s2218_s23   ;;  %p1848_p0 = scmp.ge.s32.totalorder %s2218_s23, 1  ;;  %s2218_s23 = sphi %s2294_s23, %s24_s23  }
   0x4   : > { %p384_p1 = scmp.lt.s32.totalorder %s2218_s23, 3 }
   0x6   : > { %p385_p2 = pnand %p1848_p0, %p384_p1 }
   0x7   : > { %v528_v1 = vld [vmem:[%s2585_s3] sm:$0xff] (!%p385_p2)  ;;  %v529_v2 = vld [vmem:[%s2585_s3 + $0x8] sm:$0xff] (!%p385_p2)  ;;  %v2220_v4 = vmov (!%p385_p2), 0.0|0.0   ;;  %v530_v7 = vld [vmem:[%s2585_s3 + $0x10] sm:$0xff] (!%p385_p2)  ;;  %vm2221_vm0 = vmmov (!%p385_p2), 0   ;;  %v2222_v9 = vmov (!%p385_p2), 0.0  }
   0x8   : > { %388 = sbr.rel (%p385_p2) target bundleno = 5936 (0x1730), region = 68  ;;  %v532_v3 = vld [vmem:[%s2587_s5] sm:$0xff] (!%p385_p2)  ;;  %2088 = vmatprep.subr.bf16.mxu1 (!%p385_p2), %v2220_v4  ;;  %v2080_v5 = vpack.c.bf16 (!%p385_p2), %v529_v2, %v528_v1  ;;  %v533_v6 = vld [vmem:[%s2587_s5 + $0x8] sm:$0xff] (!%p385_p2)  ;;  %v531_v8 = vld [vmem:[%s2585_s3 + $0x18] sm:$0xff] (!%p385_p2)  ;;  %1978 = vmatprep.mubr.msk.f32.mxu1 (!%p385_p2), %vm2221_vm0, %v2222_v9  ;;  %p440_p3 = scmp.lt.s32.totalorder (!%p385_p2), %s2300_s24, 1  ;;  %vm552_vm1 = vcmask (!%p385_p2), 261120  }
   0x9   : > { %v2326_v10 = vpack.c.bf16 (!%p385_p2), %v533_v6, %v532_v3  ;;  %v2084_v11 = vpack.c.bf16 (!%p385_p2), %v531_v8, %v530_v7  ;;  %v534_v12 = vld [vmem:[%s2587_s5 + $0x10] sm:$0xff] (!%p385_p2)  ;;  %v535_v13 = vld [vmem:[%s2587_s5 + $0x18] sm:$0xff] (!%p385_p2)  ;;  %v1865_v14 = vld [vmem:[%s2588_s6] ss:$0 sm:$0xff] (!%p385_p2)  ;;  %s2223_s11 = smov (!%p385_p2), 64   ;;  %v2224_v30 = vmov (!%p385_p2), 0  }
   0xa   : > { %2081 = vmatprep.subr.bf16.mxu0 (!%p385_p2), %v2080_v5  ;;  %767 = vrot.lane.b32.xlu0 (!%p385_p2), %v1865_v14, %s2223_s11  ;;  %v2342_v15 = vpack.c.bf16 (!%p385_p2), %v535_v13, %v534_v12  ;;  %v2376_v24 = vld [vmem:[%s2586_s4] ss:$0 sm:$0xff] (!%p385_p2)  ;;  %s2225_s19 = smov (!%p385_p2), 96   ;;  %s1849_s22 = sshll.u32 (!%p385_p2), %s2300_s24, 3 }
   0xb   : > { %2090 = vmatpush3.bf16.msra.mxu1 (!%p385_p2), %v2326_v10  ;;  %2083 = vmatpush3.bf16.msra.mxu0 (!%p385_p2), %v2080_v5  ;;  %p435_p4 = scmp.lt.s32.totalorder (!%p385_p2), %s1849_s22, 15 }
   0xc   : > { %2091 = vmatprep.subr.bf16.mxu1 (!%p385_p2), %v2220_v4  ;;  %2085 = vmatprep.subr.bf16.mxu0 (!%p385_p2), %v2084_v11 }
   0xd   : > { %2162 = vset.pattern.permute.xlu1 (!%p385_p2), %v2224_v30  ;;  %2163 = vset.pattern.permute.xlu0 (!%p385_p2), %v2224_v30 }
   0xf   : > { %s2338_s26 = scalar_select %p440_p3, %s2300_s24, 1  ;;  %2093 = vmatpush3.bf16.msra.mxu1 %v2342_v15  ;;  %2087 = vmatpush3.bf16.msra.mxu0 %v2084_v11 }
  0x10   : > { %2094 = vmatprep.subr.bf16.mxu1 %v2220_v4  ;;  %2100 = vmatprep.subr.bf16.mxu0 %v2220_v4  ;;  %s2596_s22 = smov (!%p435_p4, %s1849_s22), 15 }
  0x11   : > { %s1887_s27 = sshll.u32 %s2338_s26, 6  ;;  %s1853_s15 = sshll.u32 %s2338_s26, 3 }
  0x12   : > { %s2349_s30 = scalar_lea.vmem %s2583_s1, %s1887_s27  ;;  %1979 = vmatmul.mubr.f32.vlgmr.msra.gmra.mrb[0].mxu1 %v2222_v9  ;;  %s448_s18 = scalar_lea.vmem %s2584_s2, %s1853_s15 }
  0x13   : > { %v538_v16 = vld [vmem:[%s2349_s30] sm:$0xff]  ;;  %v539_v17 = vld [vmem:[%s2349_s30 + $0x8] sm:$0xff]  ;;  %2096 = vmatpush3.bf16.msra.mxu1 %v2326_v10  ;;  %1989 = vmatprep.mubr.msk.f32.mxu1 %vm2221_vm0, %v2222_v9  ;;  %v540_v61 = vld [vmem:[%s2349_s30 + $0x10] sm:$0xff]  ;;  %s1850_s25 = sshll.u32 %s2596_s22, 2  ;;  %s452_s16 = scalar_lea.vmem %s2594_s12, %s1853_s15 }
  0x14   : > { %1958 = vmatprep.mubr.msk.f32.mxu0 %vm552_vm1, %v538_v16  ;;  %2097 = vmatprep.subr.bf16.mxu1 %v2220_v4  ;;  %v2387_v31 = vld [vmem:[%s448_s18] sm:$0xff]  ;;  %v541_v62 = vld [vmem:[%s2349_s30 + $0x18] sm:$0xff]  ;;  %v543_v0 = vld [vmem:[%s2349_s30 + $0x28] sm:$0xff]  ;;  %s438_s29 = scalar_lea.vmem %s2582_s0, %s1850_s25 }
  0x15   : > { %1959 = vmatmul.mubr.msk.f32.vlgmr.msra.gmra.mrb[0].mxu0 %vm552_vm1, %v539_v17  ;;  %vm790_vm2 = vcmp.gt.s32.totalorder %v2387_v31, 0  ;;  %vm899_vm4 = vcmp.gt.s32.totalorder %v2387_v31, 1  ;;  %v542_v63 = vld [vmem:[%s2349_s30 + $0x20] sm:$0xff]  ;;  %v544_v1 = vld [vmem:[%s2349_s30 + $0x30] sm:$0xff]  ;;  %v545_v3 = vld [vmem:[%s2349_s30 + $0x38] sm:$0xff]  ;;  %vm1008_vm6 = vcmp.gt.s32.totalorder %v2387_v31, 2 }
  0x16   : > { %2102 = vmatpush3.bf16.msra.mxu0 %v2326_v10  ;;  %v791_v35 = vsel %vm790_vm2, 1, %v2224_v30  ;;  %v900_v55 = vsel %vm899_vm4, 1, %v2224_v30  ;;  %1961 = vmatprep.mubr.msk.f32.mxu0 %vm552_vm1, %v540_v61  ;;  %vm1117_vm8 = vcmp.gt.s32.totalorder %v2387_v31, 3  ;;  %vm1226_vm10 = vcmp.gt.s32.totalorder %v2387_v31, 4 }
  0x17   : > { %2103 = vmatprep.subr.bf16.mxu0 %v2220_v4  ;;  %2099 = vmatpush3.bf16.msra.mxu1 %v2342_v15  ;;  %vm1335_vm12 = vcmp.gt.s32.totalorder %v2387_v31, 5  ;;  %vm1444_vm14 = vcmp.gt.s32.totalorder %v2387_v31, 6  ;;  %vm1553_vm2 = vcmp.gt.s32.totalorder %v2387_v31, 7  ;;  %vm1653_vm4 = vcmask 1042434  }
  0x18   : > { %2106 = vmatprep.subr.bf16.mxu1 %v2220_v4 }
  0x19   : > { %1962 = vmatmul.mubr.msk.f32.gmra.mrb[2].mxu0 %vm552_vm1, %v541_v62 }
  0x1a   : > { %2105 = vmatpush3.bf16.msra.mxu0 %v2342_v15  ;;  %1964 = vmatprep.mubr.msk.f32.mxu0 %vm552_vm1, %v542_v63 }
  0x1b   : > { %2112 = vmatprep.subr.bf16.mxu0 %v2220_v4 }
  0x1d   : > { %1965 = vmatmul.mubr.msk.f32.gmra.mrb[4].mxu0 %vm552_vm1, %v543_v0 }
  0x1e   : > { %1967 = vmatprep.mubr.msk.f32.mxu0 %vm552_vm1, %v544_v1 }
  0x21   : > { %1968 = vmatmul.mubr.msk.f32.gmra.mrb[6].mxu0 %vm552_vm1, %v545_v3 }
  0x22   : > { %2000 = vmatprep.mubr.msk.f32.mxu0 %vm2221_vm0, %v2222_v9 }
  0x7c   : > { %v2369_v18 = vpop.permute.xlu0 %767 }
  0xe5   : > { %v751_v19 = vpop.f32.mrb[0].mxu1 }
  0xe6   : > { %v770_v21 = vadd.f32 %v2369_v18, %v751_v19  ;;  %v1980_v22 = vpop.f32.mrb[1].mxu1 }
  0xe8   : > { %v1960_v20 = vpop.f32.mrb[0].mxu0  ;;  %772 = vrot.lane.b32.xlu0 %v770_v21, %s2223_s11 }
  0xe9   : > { %v643_v23 = vpop.f32.mrb[1].mxu0  ;;  %v649_v50 = vadd.f32 %v1960_v20, %v2376_v24 }
  0xea   : > { %v644_v25 = vadd.f32 %v2376_v24, %v643_v23 }
  0xec   : > { %v755_v26 = vadd.f32 %v751_v19, %v644_v25  ;;  %v1963_v14 = vpop.f32.mrb[2].mxu0 }
  0xed   : > { %v653_v16 = vpop.f32.mrb[3].mxu0 }
  0xee   : > { %v1864_v27 = vmul.f32 -1.442695, %v755_v26 }
  0xf0   : > { %2164 = vpow2.f32 %v1864_v27  ;;  %v2423_v17 = vpop.f32.mrb[4].mxu0  ;;  %v1009_v27 = vsel %vm1008_vm6, 1, %v2224_v30  ;;  %vm1657_vm6 = vcmask 1044484  }
  0xf1   : > { %v2425_v19 = vpop.f32.mrb[5].mxu0 }
  0xf4   : > { %v2427_v20 = vpop.f32.mrb[6].mxu0 }
  0xf5   : > { %v2429_v21 = vpop.f32.mrb[7].mxu0 }
  0xfa   : > { %v2165_v28 = vpop.eup %2164 }
  0xfb   : > { %v759_v29 = vadd.f32 1.0, %v2165_v28  ;;  %v654_v28 = vadd.f32 %v2376_v24, %v653_v16  ;;  %v664_v16 = vadd.f32 %v2376_v24, %v2425_v19 }
  0xfd   : > { %2166 = vrcp.f32 %v759_v29 }
 0x107   : > { %v2167_v32 = vpop.eup %2166 }
 0x108   : > { %v782_v39 = vsub.f32 1.0, %v2167_v32  ;;  %v788_v42 = vmul.f32 0.0, %v2167_v32 }
 0x15a   : > { %v773_v33 = vpop.permute.xlu0 %772 }
 0x15b   : > { %v775_v34 = vmul.f32 %v2167_v32, %v773_v33 }
 0x15d   : > { %777 = vrot.lane.b32.xlu1 %v775_v34, %s2223_s11 }
 0x161   : > { %793 = vperm.xlu1 %2162, %v791_v35  }
 0x1cf   : > { %v778_v36 = vpop.permute.xlu1 %777 }
 0x1d0   : > { %v780_v37 = vadd.f32 %v778_v36, %v644_v25 }
 0x1d2   : > { %2168 = vtanh.f32 %v780_v37 }
 0x1dc   : > { %v2169_v38 = vpop.eup %2168 }
 0x1dd   : > { %784 = vrot.lane.b32.xlu0 %v2169_v38, %s2225_s19 }
 0x1e0   : > { %v794_v40 = vpop.permute.xlu1 %793 }
 0x1e1   : > { %vm795_vm3 = vcmp.eq.s32.totalorder %v794_v40, 1 }
 0x24f   : > { %v785_v41 = vpop.permute.xlu0 %784 }
 0x250   : > { %v787_v43 = vmul.f32 %v785_v41, %v782_v39 }
 0x252   : > { %v789_v44 = vadd.f32 %v788_v42, %v787_v43 }
 0x254   : > { %v796_v45 = vsel %vm795_vm3, %v789_v44, 0.0  ;;  %vm1651_vm3 = vcmask 1041409  }
 0x255   : > { %798 = vrot.lane.b32.xlu1 %v796_v45, %s2225_s19 }
 0x2c7   : > { %v799_v46 = vpop.permute.xlu1 %798 }
 0x2c8   : > { %1990 = vmatmul.mubr.msk.f32.vlgmr.msra.gmra.mrb[2].mxu1 %vm552_vm1, %v799_v46 }
 0x2c9   : > { %2108 = vmatpush3.bf16.msra.mxu1 %v2326_v10  ;;  %2011 = vmatprep.mubr.msk.f32.mxu1 %vm2221_vm0, %v2222_v9 }
 0x2ca   : > { %2109 = vmatprep.subr.bf16.mxu1 %v2220_v4 }
 0x2cd   : > { %2111 = vmatpush3.bf16.msra.mxu1 %v2342_v15 }
 0x2ce   : > { %2118 = vmatprep.subr.bf16.mxu1 %v2220_v4 }
 0x39b   : > { %v868_v47 = vpop.f32.mrb[2].mxu1 }
 0x39c   : > { %v879_v48 = vadd.f32 %v868_v47, %v2369_v18  ;;  %v1991_v49 = vpop.f32.mrb[3].mxu1  ;;  %v872_v51 = vadd.f32 %v868_v47, %v649_v50 }
 0x39e   : > { %881 = vrot.lane.b32.xlu0 %v879_v48, %s2223_s11  ;;  %v1867_v52 = vmul.f32 -1.442695, %v872_v51 }
 0x3a0   : > { %2170 = vpow2.f32 %v1867_v52  ;;  %v1118_v52 = vsel %vm1117_vm8, 1, %v2224_v30  ;;  %vm1661_vm8 = vcmask 1046534  }
 0x3a2   : > { %902 = vperm.xlu0 %2163, %v900_v55  }
 0x3aa   : > { %v2171_v53 = vpop.eup %2170 }
 0x3ab   : > { %v876_v54 = vadd.f32 1.0, %v2171_v53  ;;  %v659_v53 = vadd.f32 %v1963_v14, %v2376_v24  ;;  %v1227_v14 = vsel %vm1226_vm10, 1, %v2224_v30 }
 0x3ad   : > { %2172 = vrcp.f32 %v876_v54 }
 0x3b7   : > { %v2173_v56 = vpop.eup %2172 }
 0x3b8   : > { %v891_v5 = vsub.f32 1.0, %v2173_v56  ;;  %v897_v8 = vmul.f32 %v2173_v56, %v796_v45 }
 0x410   : > { %v882_v57 = vpop.permute.xlu0 %881 }
 0x411   : > { %v884_v58 = vmul.f32 %v2173_v56, %v882_v57 }
 0x413   : > { %886 = vrot.lane.b32.xlu1 %v884_v58, %s2223_s11 }
 0x421   : > { %v903_v6 = vpop.permute.xlu0 %902 }
 0x422   : > { %vm904_vm5 = vcmp.eq.s32.totalorder %v903_v6, 1 }
 0x485   : > { %v887_v59 = vpop.permute.xlu1 %886 }
 0x486   : > { %v889_v60 = vadd.f32 %v887_v59, %v649_v50 }
 0x488   : > { %2174 = vtanh.f32 %v889_v60 }
 0x492   : > { %v2175_v2 = vpop.eup %2174 }
 0x493   : > { %893 = vrot.lane.b32.xlu1 %v2175_v2, %s2225_s19 }
 0x505   : > { %v894_v7 = vpop.permute.xlu1 %893 }
 0x506   : > { %v896_v11 = vmul.f32 %v894_v7, %v891_v5 }
 0x508   : > { %v898_v12 = vadd.f32 %v897_v8, %v896_v11 }
 0x50a   : > { %v905_v13 = vsel %vm904_vm5, %v898_v12, %v796_v45  ;;  %vm1655_vm5 = vcmask 1043459  }
 0x50b   : > { %907 = vrot.lane.b32.xlu1 %v905_v13, %s2225_s19 }
 0x57d   : > { %v908_v22 = vpop.permute.xlu1 %907 }
 0x57e   : > { %2001 = vmatmul.mubr.msk.f32.vlgmr.msra.gmra.mrb[8].mxu0 %vm552_vm1, %v908_v22 }
 0x57f   : > { %2114 = vmatpush3.bf16.msra.mxu0 %v2326_v10  ;;  %2022 = vmatprep.mubr.msk.f32.mxu0 %vm2221_vm0, %v2222_v9 }
 0x580   : > { %2115 = vmatprep.subr.bf16.mxu0 %v2220_v4 }
 0x583   : > { %2117 = vmatpush3.bf16.msra.mxu0 %v2342_v15 }
 0x584   : > { %2124 = vmatprep.subr.bf16.mxu0 %v2220_v4 }
 0x651   : > { %v977_v23 = vpop.f32.mrb[8].mxu0 }
 0x652   : > { %v988_v25 = vadd.f32 %v977_v23, %v2369_v18  ;;  %v2002_v26 = vpop.f32.mrb[9].mxu0  ;;  %v981_v29 = vadd.f32 %v977_v23, %v654_v28 }
 0x654   : > { %990 = vrot.lane.b32.xlu0 %v988_v25, %s2223_s11  ;;  %v1869_v32 = vmul.f32 -1.442695, %v981_v29 }
 0x656   : > { %2176 = vpow2.f32 %v1869_v32 }
 0x658   : > { %1011 = vperm.xlu0 %2163, %v1009_v27  }
 0x660   : > { %v2177_v33 = vpop.eup %2176 }
 0x661   : > { %v985_v34 = vadd.f32 1.0, %v2177_v33 }
 0x663   : > { %2178 = vrcp.f32 %v985_v34 }
 0x66d   : > { %v2179_v35 = vpop.eup %2178 }
 0x66e   : > { %v1000_v41 = vsub.f32 1.0, %v2179_v35  ;;  %v1006_v44 = vmul.f32 %v2179_v35, %v905_v13 }
 0x6c6   : > { %v991_v36 = vpop.permute.xlu0 %990 }
 0x6c7   : > { %v993_v37 = vmul.f32 %v2179_v35, %v991_v36 }
 0x6c9   : > { %995 = vrot.lane.b32.xlu1 %v993_v37, %s2223_s11 }
 0x6d7   : > { %v1012_v43 = vpop.permute.xlu0 %1011 }
 0x6d8   : > { %vm1013_vm7 = vcmp.eq.s32.totalorder %v1012_v43, 1 }
 0x73b   : > { %v996_v38 = vpop.permute.xlu1 %995 }
 0x73c   : > { %v998_v39 = vadd.f32 %v996_v38, %v654_v28 }
 0x73e   : > { %2180 = vtanh.f32 %v998_v39 }
 0x748   : > { %v2181_v40 = vpop.eup %2180 }
 0x749   : > { %1002 = vrot.lane.b32.xlu1 %v2181_v40, %s2225_s19 }
 0x7bb   : > { %v1003_v42 = vpop.permute.xlu1 %1002 }
 0x7bc   : > { %v1005_v45 = vmul.f32 %v1003_v42, %v1000_v41 }
 0x7be   : > { %v1007_v46 = vadd.f32 %v1006_v44, %v1005_v45  ;;  %v1336_v45 = vsel %vm1335_vm12, 1, %v2224_v30 }
 0x7c0   : > { %v1014_v47 = vsel %vm1013_vm7, %v1007_v46, %v905_v13  ;;  %vm1659_vm7 = vcmask 1045509  }
 0x7c1   : > { %1016 = vrot.lane.b32.xlu0 %v1014_v47, %s2225_s19 }
 0x833   : > { %v1017_v48 = vpop.permute.xlu0 %1016 }
 0x834   : > { %2012 = vmatmul.mubr.msk.f32.vlgmr.msra.gmra.mrb[4].mxu1 %vm552_vm1, %v1017_v48 }
 0x835   : > { %2120 = vmatpush3.bf16.msra.mxu1 %v2326_v10  ;;  %2033 = vmatprep.mubr.msk.f32.mxu1 %vm2221_vm0, %v2222_v9 }
 0x836   : > { %2121 = vmatprep.subr.bf16.mxu1 %v2220_v4 }
 0x839   : > { %2123 = vmatpush3.bf16.msra.mxu1 %v2342_v15 }
 0x83a   : > { %2130 = vmatprep.subr.bf16.mxu1 %v2220_v4 }
 0x907   : > { %v1086_v49 = vpop.f32.mrb[4].mxu1 }
 0x908   : > { %v1097_v50 = vadd.f32 %v1086_v49, %v2369_v18  ;;  %v2013_v51 = vpop.f32.mrb[5].mxu1  ;;  %v1090_v54 = vadd.f32 %v1086_v49, %v659_v53 }
 0x90a   : > { %1099 = vrot.lane.b32.xlu1 %v1097_v50, %s2223_s11  ;;  %v1871_v55 = vmul.f32 -1.442695, %v1090_v54 }
 0x90c   : > { %2182 = vpow2.f32 %v1871_v55 }
 0x90e   : > { %1120 = vperm.xlu1 %2162, %v1118_v52  }
 0x916   : > { %v2183_v56 = vpop.eup %2182 }
 0x917   : > { %v1094_v57 = vadd.f32 1.0, %v2183_v56 }
 0x919   : > { %2184 = vrcp.f32 %v1094_v57 }
 0x923   : > { %v2185_v58 = vpop.eup %2184 }
 0x924   : > { %v1109_v0 = vsub.f32 1.0, %v2185_v58  ;;  %v1115_v3 = vmul.f32 %v2185_v58, %v1014_v47 }
 0x97c   : > { %v1100_v59 = vpop.permute.xlu1 %1099 }
 0x97d   : > { %v1102_v60 = vmul.f32 %v2185_v58, %v1100_v59 }
 0x97f   : > { %1104 = vrot.lane.b32.xlu0 %v1102_v60, %s2223_s11 }
 0x98d   : > { %v1121_v2 = vpop.permute.xlu1 %1120 }
 0x98e   : > { %vm1122_vm9 = vcmp.eq.s32.totalorder %v1121_v2, 1  ;;  %v674_v2 = vadd.f32 %v2376_v24, %v2429_v21 }
 0x9f1   : > { %v1105_v61 = vpop.permute.xlu0 %1104 }
 0x9f2   : > { %v1107_v62 = vadd.f32 %v1105_v61, %v659_v53 }
 0x9f4   : > { %2186 = vtanh.f32 %v1107_v62 }
 0x9fe   : > { %v2187_v63 = vpop.eup %2186 }
 0x9ff   : > { %1111 = vrot.lane.b32.xlu0 %v2187_v63, %s2225_s19 }
 0xa71   : > { %v1112_v1 = vpop.permute.xlu0 %1111 }
 0xa72   : > { %v1114_v5 = vmul.f32 %v1112_v1, %v1109_v0  ;;  %v1445_v1 = vsel %vm1444_vm14, 1, %v2224_v30 }
 0xa74   : > { %v1116_v6 = vadd.f32 %v1115_v3, %v1114_v5 }
 0xa76   : > { %v1123_v7 = vsel %vm1122_vm9, %v1116_v6, %v1014_v47  ;;  %vm1663_vm9 = vcmask 1047559  }
 0xa77   : > { %1125 = vrot.lane.b32.xlu1 %v1123_v7, %s2225_s19 }
 0xae9   : > { %v1126_v8 = vpop.permute.xlu1 %1125 }
 0xaea   : > { %2023 = vmatmul.mubr.msk.f32.vlgmr.msra.gmra.mrb[10].mxu0 %vm552_vm1, %v1126_v8 }
 0xaeb   : > { %2126 = vmatpush3.bf16.msra.mxu0 %v2326_v10  ;;  %2044 = vmatprep.mubr.msk.f32.mxu0 %vm2221_vm0, %v2222_v9 }
 0xaec   : > { %2127 = vmatprep.subr.bf16.mxu0 %v2220_v4 }
 0xaef   : > { %2129 = vmatpush3.bf16.msra.mxu0 %v2342_v15 }
 0xaf0   : > { %2136 = vmatprep.subr.bf16.mxu0 %v2220_v4 }
 0xbbd   : > { %v1195_v11 = vpop.f32.mrb[10].mxu0 }
 0xbbe   : > { %v1206_v12 = vadd.f32 %v1195_v11, %v2369_v18  ;;  %v2024_v13 = vpop.f32.mrb[11].mxu0  ;;  %v1199_v22 = vadd.f32 %v1195_v11, %v664_v16 }
 0xbc0   : > { %1208 = vrot.lane.b32.xlu0 %v1206_v12, %s2223_s11  ;;  %v1873_v23 = vmul.f32 -1.442695, %v1199_v22 }
 0xbc2   : > { %2188 = vpow2.f32 %v1873_v23 }
 0xbc4   : > { %1229 = vperm.xlu0 %2163, %v1227_v14  }
 0xbcc   : > { %v2189_v25 = vpop.eup %2188 }
 0xbcd   : > { %v1203_v26 = vadd.f32 1.0, %v2189_v25 }
 0xbcf   : > { %2190 = vrcp.f32 %v1203_v26 }
 0xbd9   : > { %v2191_v27 = vpop.eup %2190 }
 0xbda   : > { %v1218_v35 = vsub.f32 1.0, %v2191_v27  ;;  %v1224_v37 = vmul.f32 %v2191_v27, %v1123_v7 }
 0xc32   : > { %v1209_v28 = vpop.permute.xlu0 %1208 }
 0xc33   : > { %v1211_v29 = vmul.f32 %v2191_v27, %v1209_v28 }
 0xc35   : > { %1213 = vrot.lane.b32.xlu1 %v1211_v29, %s2223_s11 }
 0xc43   : > { %v1230_v19 = vpop.permute.xlu0 %1229 }
 0xc44   : > { %vm1231_vm11 = vcmp.eq.s32.totalorder %v1230_v19, 1 }
 0xca7   : > { %v1214_v32 = vpop.permute.xlu1 %1213 }
 0xca8   : > { %v1216_v33 = vadd.f32 %v1214_v32, %v664_v16 }
 0xcaa   : > { %2192 = vtanh.f32 %v1216_v33 }
 0xcb4   : > { %v2193_v34 = vpop.eup %2192 }
 0xcb5   : > { %1220 = vrot.lane.b32.xlu1 %v2193_v34, %s2225_s19 }
 0xd27   : > { %v1221_v36 = vpop.permute.xlu1 %1220 }
 0xd28   : > { %v1223_v38 = vmul.f32 %v1221_v36, %v1218_v35  ;;  %v1554_v35 = vsel %vm1553_vm2, 1, %v2224_v30  ;;  %v679_v36 = vadd.f32 %v2427_v20, %v2376_v24  ;;  %v1561_v30 = vld [vmem:[%s2589_s7 + $0x8] sm:$0xff]  ;;  %v1564_v20 = vld [vmem:[%s2590_s8] sm:$0xff] }
 0xd2a   : > { %v1225_v39 = vadd.f32 %v1224_v37, %v1223_v38 }
 0xd2c   : > { %v1232_v40 = vsel %vm1231_vm11, %v1225_v39, %v1123_v7  ;;  %vm1765_vm11 = vcmask 7168  }
 0xd2d   : > { %1234 = vrot.lane.b32.xlu0 %v1232_v40, %s2225_s19 }
 0xd9f   : > { %v1235_v41 = vpop.permute.xlu0 %1234 }
 0xda0   : > { %2034 = vmatmul.mubr.msk.f32.vlgmr.msra.gmra.mrb[6].mxu1 %vm552_vm1, %v1235_v41 }
 0xda1   : > { %2132 = vmatpush3.bf16.msra.mxu1 %v2326_v10  ;;  %2055 = vmatprep.mubr.msk.f32.mxu1 %vm2221_vm0, %v2222_v9  ;;  %v669_v10 = vadd.f32 %v2423_v17, %v2376_v24  ;;  %v1560_v24 = vld [vmem:[%s2589_s7] sm:$0xff] }
 0xda2   : > { %2133 = vmatprep.subr.bf16.mxu1 %v2220_v4 }
 0xda5   : > { %2135 = vmatpush3.bf16.msra.mxu1 %v2342_v15 }
 0xda6   : > { %2142 = vmatprep.subr.bf16.mxu1 %v2220_v4 }
 0xe73   : > { %v1304_v42 = vpop.f32.mrb[6].mxu1 }
 0xe74   : > { %v1315_v43 = vadd.f32 %v1304_v42, %v2369_v18  ;;  %v2035_v44 = vpop.f32.mrb[7].mxu1  ;;  %v1308_v46 = vadd.f32 %v1304_v42, %v669_v10  ;;  %v2143_v42 = vpack.c.bf16 %v1561_v30, %v1560_v24 }
 0xe75   : > { %v1562_v44 = vld [vmem:[%s2589_s7 + $0x10] sm:$0xff] }
 0xe76   : > { %1317 = vrot.lane.b32.xlu1 %v1315_v43, %s2223_s11  ;;  %v1875_v47 = vmul.f32 -1.442695, %v1308_v46  ;;  %v1565_v43 = vld [vmem:[%s2590_s8 + $0x8] sm:$0xff]  ;;  %v1566_v46 = vld [vmem:[%s2590_s8 + $0x10] sm:$0xff] }
 0xe78   : > { %2194 = vpow2.f32 %v1875_v47  ;;  %v1567_v47 = vld [vmem:[%s2590_s8 + $0x18] sm:$0xff] }
 0xe7a   : > { %1338 = vperm.xlu1 %2162, %v1336_v45   ;;  %v1563_v45 = vld [vmem:[%s2589_s7 + $0x18] sm:$0xff] }
 0xe82   : > { %v2195_v15 = vpop.eup %2194 }
 0xe83   : > { %v1312_v48 = vadd.f32 1.0, %v2195_v15  ;;  %v2146_v15 = vpack.c.bf16 %v1563_v45, %v1562_v44 }
 0xe85   : > { %2196 = vrcp.f32 %v1312_v48  ;;  %v2140_v48 = vpack.c.bf16 %v1567_v47, %v1566_v46 }
 0xe8f   : > { %v2197_v49 = vpop.eup %2196 }
 0xe90   : > { %v1327_v55 = vsub.f32 1.0, %v2197_v49  ;;  %v1333_v57 = vmul.f32 %v2197_v49, %v1232_v40 }
 0xee8   : > { %v1318_v50 = vpop.permute.xlu1 %1317 }
 0xee9   : > { %v1320_v51 = vmul.f32 %v2197_v49, %v1318_v50  ;;  %v453_v50 = vld [vmem:[%s438_s29] sm:$0xf] }
 0xeeb   : > { %1322 = vrot.lane.b32.xlu0 %v1320_v51, %s2223_s11  ;;  %v454_v51 = vld [vmem:[%s438_s29 + $0x4] sm:$0xf] }
 0xef9   : > { %v1339_v17 = vpop.permute.xlu1 %1338 }
 0xefa   : > { %vm1340_vm13 = vcmp.eq.s32.totalorder %v1339_v17, 1 }
 0xf5d   : > { %v1323_v52 = vpop.permute.xlu0 %1322 }
 0xf5e   : > { %v1325_v53 = vadd.f32 %v1323_v52, %v669_v10  ;;  %v2137_v10 = vpack.c.bf16 %v1565_v43, %v1564_v20  ;;  %v455_v52 = vld [vmem:[%s438_s29 + $0x8] sm:$0xf] }
 0xf60   : > { %2198 = vtanh.f32 %v1325_v53 }
 0xf6a   : > { %v2199_v54 = vpop.eup %2198 }
 0xf6b   : > { %1329 = vrot.lane.b32.xlu0 %v2199_v54, %s2225_s19  ;;  %v456_v54 = vld [vmem:[%s438_s29 + $0xc] sm:$0xf] }
 0xfdd   : > { %v1330_v56 = vpop.permute.xlu0 %1329 }
 0xfde   : > { %v1332_v58 = vmul.f32 %v1330_v56, %v1327_v55 }
 0xfe0   : > { %v1334_v59 = vadd.f32 %v1333_v57, %v1332_v58  ;;  %v457_v57 = vld [vmem:[%s438_s29 + $0x10] sm:$0xf] }
 0xfe2   : > { %v1341_v60 = vsel %vm1340_vm13, %v1334_v59, %v1232_v40 }
 0xfe3   : > { %1343 = vrot.lane.b32.xlu1 %v1341_v60, %s2225_s19 }
0x1055   : > { %v1344_v61 = vpop.permute.xlu1 %1343 }
0x1056   : > { %2045 = vmatmul.mubr.msk.f32.vlgmr.msra.gmra.mrb[12].mxu0 %vm552_vm1, %v1344_v61 }
0x1057   : > { %2066 = vmatprep.mubr.msk.f32.mxu0 %vm2221_vm0, %v2222_v9  ;;  %2138 = vmatpush3.bf16.msra.mxu0 %v2137_v10 }
0x1058   : > { %2139 = vmatprep.subr.bf16.mxu0 %v2220_v4 }
0x105b   : > { %2141 = vmatpush3.bf16.msra.mxu0 %v2140_v48 }
0x1129   : > { %v1413_v62 = vpop.f32.mrb[12].mxu0 }
0x112a   : > { %v1424_v63 = vadd.f32 %v1413_v62, %v2369_v18  ;;  %v2046_v0 = vpop.f32.mrb[13].mxu0  ;;  %v1417_v3 = vadd.f32 %v1413_v62, %v674_v2 }
0x112c   : > { %1426 = vrot.lane.b32.xlu0 %v1424_v63, %s2223_s11  ;;  %v1877_v5 = vmul.f32 -1.442695, %v1417_v3 }
0x112e   : > { %2200 = vpow2.f32 %v1877_v5 }
0x1130   : > { %1447 = vperm.xlu0 %2163, %v1445_v1   ;;  %v459_v1 = vld [vmem:[%s438_s29 + $0x18] sm:$0xf] }
0x1138   : > { %v2201_v6 = vpop.eup %2200 }
0x1139   : > { %v1421_v7 = vadd.f32 1.0, %v2201_v6  ;;  %v460_v6 = vld [vmem:[%s438_s29 + $0x1c] sm:$0xf] }
0x113b   : > { %2202 = vrcp.f32 %v1421_v7 }
0x1145   : > { %v2203_v8 = vpop.eup %2202 }
0x1146   : > { %v1436_v22 = vsub.f32 1.0, %v2203_v8  ;;  %v1442_v25 = vmul.f32 %v2203_v8, %v1341_v60 }
0x119e   : > { %v1427_v11 = vpop.permute.xlu0 %1426 }
0x119f   : > { %v1429_v12 = vmul.f32 %v2203_v8, %v1427_v11 }
0x11a1   : > { %1431 = vrot.lane.b32.xlu1 %v1429_v12, %s2223_s11 }
0x11af   : > { %v1448_v21 = vpop.permute.xlu0 %1447 }
0x11b0   : > { %vm1449_vm15 = vcmp.eq.s32.totalorder %v1448_v21, 1 }
0x1213   : > { %v1432_v13 = vpop.permute.xlu1 %1431 }
0x1214   : > { %v1434_v14 = vadd.f32 %v1432_v13, %v674_v2 }
0x1216   : > { %2204 = vtanh.f32 %v1434_v14 }
0x1220   : > { %v2205_v16 = vpop.eup %2204 }
0x1221   : > { %1438 = vrot.lane.b32.xlu1 %v2205_v16, %s2225_s19 }
0x1293   : > { %v1439_v23 = vpop.permute.xlu1 %1438 }
0x1294   : > { %v1441_v26 = vmul.f32 %v1439_v23, %v1436_v22 }
0x1296   : > { %v1443_v27 = vadd.f32 %v1442_v25, %v1441_v26 }
0x1298   : > { %v2504_v28 = vsel %vm1449_vm15, %v1443_v27, %v1341_v60  ;;  %v458_v60 = vld [vmem:[%s438_s29 + $0x14] sm:$0xf] }
0x1299   : > { %1452 = vrot.lane.b32.xlu0 %v2504_v28, %s2225_s19 }
0x130b   : > { %v1453_v29 = vpop.permute.xlu0 %1452 }
0x130c   : > { %2056 = vmatmul.mubr.msk.f32.vlgmr.msra.gmra.mrb[8].mxu1 %vm552_vm1, %v1453_v29 }
0x130d   : > { %2077 = vmatprep.mubr.msk.f32.mxu1 %vm2221_vm0, %v2222_v9  ;;  %2144 = vmatpush3.bf16.msra.mxu1 %v2143_v42  ;;  %vm461_vm0 = vcmask 257024  }
0x130e   : > { %2145 = vmatprep.subr.bf16.mxu1 %v2220_v4  ;;  %v462_v53 = vsel %vm461_vm0, %v453_v50, 0.0  ;;  %v469_v4 = vsel %vm461_vm0, %v454_v51, 0.0  ;;  %v476_v17 = vsel %vm461_vm0, %v455_v52, 0.0  ;;  %v483_v59 = vsel %vm461_vm0, %v456_v54, 0.0 }
0x130f   : > { %v463_v55 = vrot.slane %v462_v53, 4  ;;  %v470_v56 = vrot.slane %v469_v4, 4  ;;  %v477_v58 = vrot.slane %v476_v17, 4  ;;  %v484_v63 = vrot.slane %v483_v59, 4 }
0x1310   : > { %v490_v0 = vsel %vm461_vm0, %v457_v57, 0.0  ;;  %v497_v5 = vsel %vm461_vm0, %v458_v60, 0.0  ;;  %v504_v16 = vsel %vm461_vm0, %v459_v1, 0.0  ;;  %v511_v22 = vsel %vm461_vm0, %v460_v6, 0.0 }
0x1311   : > { %2147 = vmatpush3.bf16.msra.mxu1 %v2146_v15  ;;  %v464_v61 = vadd.f32 %v463_v55, %v462_v53  ;;  %v471_v62 = vadd.f32 %v470_v56, %v469_v4  ;;  %v478_v2 = vadd.f32 %v477_v58, %v476_v17  ;;  %v491_v3 = vrot.slane %v490_v0, 4 }
0x1312   : > { %v485_v11 = vadd.f32 %v484_v63, %v483_v59  ;;  %v498_v12 = vrot.slane %v497_v5, 4 }
0x1313   : > { %v465_v7 = vrot.slane %v464_v61, 2  ;;  %v472_v8 = vrot.slane %v471_v62, 2  ;;  %v479_v13 = vrot.slane %v478_v2, 2  ;;  %v492_v14 = vadd.f32 %v491_v3, %v490_v0 }
0x1314   : > { %v486_v25 = vrot.slane %v485_v11, 2  ;;  %v499_v26 = vadd.f32 %v498_v12, %v497_v5 }
0x1315   : > { %v466_v23 = vadd.f32 %v465_v7, %v464_v61  ;;  %v473_v21 = vadd.f32 %v472_v8, %v471_v62  ;;  %v480_v27 = vadd.f32 %v479_v13, %v478_v2  ;;  %v493_v29 = vrot.slane %v492_v14, 2 }
0x13df   : > { %v1522_v32 = vpop.f32.mrb[8].mxu1 }
0x13e0   : > { %v1533_v33 = vadd.f32 %v1522_v32, %v2369_v18  ;;  %v2057_v34 = vpop.f32.mrb[9].mxu1  ;;  %v1526_v19 = vadd.f32 %v1522_v32, %v679_v36  ;;  %v505_v32 = vrot.slane %v504_v16, 4 }
0x13e1   : > { %v467_v34 = vrot.slane %v466_v23, 1 }
0x13e2   : > { %1535 = vrot.lane.b32.xlu1 %v1533_v33, %s2223_s11  ;;  %v1879_v37 = vmul.f32 -1.442695, %v1526_v19  ;;  %v512_v33 = vrot.slane %v511_v22, 4  ;;  %v500_v19 = vrot.slane %v499_v26, 2 }
0x13e4   : > { %2206 = vpow2.f32 %v1879_v37  ;;  %v481_v37 = vrot.slane %v480_v27, 1  ;;  %v501_v24 = vadd.f32 %v500_v19, %v499_v26 }
0x13e6   : > { %1556 = vperm.xlu1 %2162, %v1554_v35   ;;  %v474_v35 = vrot.slane %v473_v21, 1  ;;  %v482_v30 = vadd.f32 %v481_v37, %v480_v27  ;;  %v502_v45 = vrot.slane %v501_v24, 1  ;;  %v1884_v27 = vld [vmem:[#allocation2] ss:$0 sm:$0xff] }
0x13e8   : > { %v503_v50 = vadd.f32 %v502_v45, %v501_v24 }
0x13ea   : > { %v524_v55 = vmul.f32 0.25, %v503_v50 }
0x13ee   : > { %v2207_v38 = vpop.eup %2206 }
0x13ef   : > { %v1530_v39 = vadd.f32 1.0, %v2207_v38  ;;  %v494_v38 = vadd.f32 %v493_v29, %v492_v14 }
0x13f1   : > { %2208 = vrcp.f32 %v1530_v39  ;;  %v506_v39 = vadd.f32 %v505_v32, %v504_v16  ;;  %v495_v20 = vrot.slane %v494_v38, 1  ;;  %v1882_v16 = vld [vmem:[%s2591_s9] ss:$0 sm:$0xff] }
0x13f3   : > { %v507_v42 = vrot.slane %v506_v39, 2  ;;  %v496_v47 = vadd.f32 %v495_v20, %v494_v38 }
0x13f5   : > { %v508_v15 = vadd.f32 %v507_v42, %v506_v39  ;;  %v523_v4 = vmul.f32 0.25, %v496_v47 }
0x13f7   : > { %v509_v52 = vrot.slane %v508_v15, 1 }
0x13f9   : > { %v510_v17 = vadd.f32 %v509_v52, %v508_v15 }
0x13fb   : > { %v2517_v9 = vpop.eup %2208  ;;  %v525_v60 = vmul.f32 0.25, %v510_v17 }
0x13fc   : > { %v1545_v1 = vsub.f32 1.0, %v2517_v9  ;;  %v1551_v5 = vmul.f32 %v2517_v9, %v2504_v28 }
0x1454   : > { %v1536_v18 = vpop.permute.xlu1 %1535 }
0x1455   : > { %v1538_v40 = vmul.f32 %v2517_v9, %v1536_v18  ;;  %v513_v18 = vadd.f32 %v512_v33, %v511_v22 }
0x1457   : > { %1540 = vrot.lane.b32.xlu0 %v1538_v40, %s2223_s11  ;;  %v468_v40 = vadd.f32 %v467_v34, %v466_v23  ;;  %v514_v43 = vrot.slane %v513_v18, 2 }
0x1459   : > { %v519_v10 = vmul.f32 0.25, %v468_v40  ;;  %v515_v48 = vadd.f32 %v514_v43, %v513_v18 }
0x145b   : > { %v516_v53 = vrot.slane %v515_v48, 1 }
0x145d   : > { %v517_v57 = vadd.f32 %v516_v53, %v515_v48 }
0x145f   : > { %v526_v61 = vmul.f32 0.25, %v517_v57 }
0x1465   : > { %v1557_v3 = vpop.permute.xlu1 %1556 }
0x1466   : > { %vm1558_vm10 = vcmp.eq.s32.totalorder %v1557_v3, 1 }
0x14c9   : > { %v1541_v31 = vpop.permute.xlu0 %1540 }
0x14ca   : > { %v1543_v41 = vadd.f32 %v1541_v31, %v679_v36  ;;  %v487_v36 = vadd.f32 %v486_v25, %v485_v11  ;;  %v475_v31 = vadd.f32 %v474_v35, %v473_v21 }
0x14cc   : > { %2210 = vtanh.f32 %v1543_v41  ;;  %v488_v41 = vrot.slane %v487_v36, 1  ;;  %v520_v46 = vmul.f32 0.25, %v475_v31 }
0x14ce   : > { %v489_v44 = vadd.f32 %v488_v41, %v487_v36  ;;  %v1652_v54 = vsel %vm1651_vm3, %v520_v46, %v519_v10 }
0x14d0   : > { %v522_v51 = vmul.f32 0.25, %v489_v44 }
0x14d6   : > { %v2211_v49 = vpop.eup %2210 }
0x14d7   : > { %1547 = vrot.lane.b32.xlu0 %v2211_v49, %s2225_s19  ;;  %v521_v49 = vmul.f32 0.25, %v482_v30 }
0x14d9   : > { %v1654_v56 = vsel %vm1653_vm4, %v521_v49, %v1652_v54 }
0x14da   : > { %v1656_v58 = vsel %vm1655_vm5, %v522_v51, %v1654_v56 }
0x14db   : > { %v1658_v59 = vsel %vm1657_vm6, %v523_v4, %v1656_v58 }
0x14dc   : > { %v1660_v62 = vsel %vm1659_vm7, %v524_v55, %v1658_v59 }
0x14dd   : > { %v1662_v63 = vsel %vm1661_vm8, %v525_v60, %v1660_v62 }
0x14de   : > { %v1664_v0 = vsel %vm1663_vm9, %v526_v61, %v1662_v63 }
0x14df   : > { %2078 = vmatmul.mubr.msk.f32.vlgmr.msra.gmra.mrb[10].mxu1 %vm552_vm1, %v1664_v0 }
0x1549   : > { %v1548_v2 = vpop.permute.xlu0 %1547 }
0x154a   : > { %v1550_v6 = vmul.f32 %v1548_v2, %v1545_v1 }
0x154c   : > { %v1552_v7 = vadd.f32 %v1551_v5, %v1550_v6 }
0x154e   : > { %v1559_v8 = vsel %vm1558_vm10, %v1552_v7, %v2504_v28  ;;  %v1883_v28 = vld [vmem:[%s2592_s10] ss:$0 sm:$0xff] }
0x154f   : > { %1569 = vrot.lane.b32.xlu1 %v1559_v8, %s2225_s19 }
0x15b2   : > { %v1733_v12 = vpop.f32.mrb[10].mxu1 }
0x15b3   : > { %v2079_v13 = vpop.f32.mrb[11].mxu1 }
0x15c1   : > { %v1570_v11 = vpop.permute.xlu1 %1569 }
0x15c2   : > { %2067 = vmatmul.mubr.msk.f32.vlgmr.msra.gmra.mrb[14].mxu0 %vm552_vm1, %v1570_v11 }
0x1695   : > { %v1639_v14 = vpop.f32.mrb[14].mxu0 }
0x1696   : > { %v1734_v22 = vadd.f32 %v1733_v12, %v1639_v14  ;;  %v2068_v9 = vpop.f32.mrb[15].mxu0 }
0x1698   : > { %v1744_v23 = vadd.f32 %v1882_v16, %v1734_v22 }
0x169a   : > { %v1745_v21 = vmax.f32 %v1744_v23, 0.0 }
0x169c   : > { %v1753_v25 = vmul.f32 %v1883_v28, %v1745_v21 }
0x169e   : > { %v1754_v26 = vsel %vm552_vm1, %v1753_v25, 0.0 }
0x169f   : > { %1755 = vadd.xlane.f32.xlu0 %v1754_v26 }
0x172c   : > { %v1756_v29 = vpop.xlane.xlu0 %1755 }
0x172d   : > { %v1764_v32 = vadd.f32 %v1884_v27, %v1756_v29 }
0x172f   : > { %1766 = vst.msk [vmem:[%s452_s16] sm:$0xff] %vm1765_vm11, %v1764_v32 }
0x1730 PF: > { %s24_s23 = sadd.s32 1, %s2218_s23  }
0x1731   : > { %p21_p5 = scmp.ge.s32.totalorder %s24_s23, 4  }
0x1733   :  { %23 = sbr.rel (!%p21_p5) target bundleno = 3 (0x3), region = 104 }

</bundles_post_ra>
